<compile_context>
chip_gen: v7x
topology: tpu7x:2x2x1
jax: 0.10.0
libtpu: 0.0.40
codegen_flags: <defaults>
</compile_context>

<pallas_src>
import functools

import jax
import jax.numpy as jnp
from jax.experimental import pallas as pl
from jax.experimental.pallas import tpu as pltpu

EPS = 1e-5


def _fold_bn(gamma, beta, mean, var):
    scale = gamma / jnp.sqrt(var + EPS)
    shift = beta - mean * scale
    return scale.astype(jnp.float32), shift.astype(jnp.float32)


def _pick_band(h, target, min_bands=1):
    """Largest divisor of h that is <= target and yields >= min_bands bands."""
    best = 1
    for d in range(1, h + 1):
        if h % d == 0 and d <= target and (h // d) >= min_bands:
            best = d
    return best


# ----------------------------------------------------------------------------
# Fused kernel: conv1(1x1)+bn1+relu -> conv2(3x3,pad=1)+bn2+relu
#               -> conv3(1x1)+bn3 + residual + relu
# One grid step processes one TH-row band of one sample.
# ----------------------------------------------------------------------------
def _bottleneck_kernel(x_mid_ref, x_up_ref, x_dn_ref,
                       w1_ref, b1_ref, w2_ref, b2_ref, w3_ref, b3_ref,
                       o_ref, y1c_ref):
    _, TH, W, Cin = x_mid_ref.shape
    P = w1_ref.shape[1]            # planes
    Cout = w3_ref.shape[1]         # planes * 4 == Cin

    b = pl.program_id(1)
    nb = pl.num_programs(1)

    # ---- conv1 (1x1) + bn1-shift + relu on band + halo rows: ONE MXU dot ----
    x_mid = x_mid_ref[0]                                  # (TH, W, Cin) bf16
    x_up = x_up_ref[0, 0]                                 # (W, Cin)     bf16
    x_dn = x_dn_ref[0, 0]                                 # (W, Cin)     bf16
    x_all = jnp.concatenate(
        [x_up, x_mid.reshape(TH * W, Cin), x_dn], axis=0)  # ((TH+2)*W, Cin)
    y1 = jnp.dot(x_all, w1_ref[...], preferred_element_type=jnp.float32)
    y1 = jnp.maximum(y1 + b1_ref[...], 0.0)               # f32
    y1 = y1.reshape(TH + 2, W, P)

    # ---- im2col-over-dx scratch: y1c[r, w, dx*P:(dx+1)*P] = y1[r, w+dx-1] ----
    zcol = jnp.zeros((TH + 2, 1, P), jnp.float32)
    y1c_ref[:, :, P:2 * P] = y1                           # dx = 1 (center)
    y1c_ref[:, 1:W, 0:P] = y1[:, 0:W - 1, :]              # dx = 0 (col w-1)
    y1c_ref[:, 0:1, 0:P] = zcol
    y1c_ref[:, 0:W - 1, 2 * P:3 * P] = y1[:, 1:W, :]      # dx = 2 (col w+1)
    y1c_ref[:, W - 1:W, 2 * P:3 * P] = zcol

    # zero-pad in H: halo rows that fall outside the image contribute nothing
    @pl.when(b == 0)
    def _():
        y1c_ref[0] = jnp.zeros((W, 3 * P), jnp.float32)

    @pl.when(b == nb - 1)
    def _():
        y1c_ref[TH + 1] = jnp.zeros((W, 3 * P), jnp.float32)

    # ---- conv2 (3x3, pad=1) + bn2-shift + relu: three K = 3*P MXU dots ----
    acc = jnp.zeros((TH * W, P), jnp.float32)
    for dy in range(3):
        patch = y1c_ref[dy:dy + TH, :, :].reshape(TH * W, 3 * P)
        acc = acc + jnp.dot(patch.astype(jnp.bfloat16), w2_ref[dy],
                            preferred_element_type=jnp.float32)
    y2 = jnp.maximum(acc + b2_ref[...], 0.0).astype(jnp.bfloat16)

    # ---- conv3 (1x1) + bn3-shift + residual + relu ----
    y3 = jnp.dot(y2, w3_ref[...], preferred_element_type=jnp.float32)
    y3 = y3 + b3_ref[...] + x_mid.reshape(TH * W, Cin).astype(jnp.float32)
    o_ref[0] = jnp.maximum(y3, 0.0).astype(o_ref.dtype)


def bottleneck_fused(x_nhwc, w1f, b1, w2r, b2, w3f, b3, *, th=16):
    N, H, W, Cin = x_nhwc.shape
    P = w1f.shape[1]
    Cout = w3f.shape[1]
    assert Cin == Cout, "residual add requires inplanes == planes * 4"

    th = _pick_band(H, th, min_bands=2 if (N == 1 and H > 1) else 1)
    nb = H // th

    # explicit VMEM budget (double-buffered bands + weights + im2col scratch)
    bpe = 2  # bf16
    wgt_bytes = (Cin * P + 9 * P * P + P * Cout) * bpe + (2 * P + Cout) * 4
    band_bytes = (th + 2) * W * Cin * bpe + th * W * Cout * bpe
    scratch_bytes = (th + 2) * W * 3 * P * 4
    need = 2 * (band_bytes + wgt_bytes) + scratch_bytes
    vmem_limit = int(min(max(2 * need + (8 << 20), 32 << 20), 64 << 20))

    flops = 2 * N * H * W * (Cin * P + 9 * P * P + P * Cout)
    bytes_accessed = N * H * W * (Cin + Cout) * bpe + wgt_bytes

    out2d = pl.pallas_call(
        _bottleneck_kernel,
        out_shape=jax.ShapeDtypeStruct((N, H * W, Cout), jnp.bfloat16),
        grid=(N, nb),
        in_specs=[
            # band rows [b*th, b*th+th)
            pl.BlockSpec((1, th, W, Cin), lambda n, b: (n, b, 0, 0)),
            # 1-row halo above (clamped at the top border, zeroed in-kernel)
            pl.BlockSpec((1, 1, W, Cin),
                         lambda n, b: (n, jnp.maximum(b * th - 1, 0), 0, 0)),
            # 1-row halo below (clamped at the bottom border, zeroed in-kernel)
            pl.BlockSpec((1, 1, W, Cin),
                         lambda n, b: (n, jnp.minimum((b + 1) * th, H - 1), 0, 0)),
            # weights / shifts: fully resident, same block every step
            pl.BlockSpec((Cin, P), lambda n, b: (0, 0)),
            pl.BlockSpec((1, P), lambda n, b: (0, 0)),
            pl.BlockSpec((3, 3 * P, P), lambda n, b: (0, 0, 0)),
            pl.BlockSpec((1, P), lambda n, b: (0, 0)),
            pl.BlockSpec((P, Cout), lambda n, b: (0, 0)),
            pl.BlockSpec((1, Cout), lambda n, b: (0, 0)),
        ],
        out_specs=pl.BlockSpec((1, th * W, Cout), lambda n, b: (n, b, 0)),
        scratch_shapes=[pltpu.VMEM((th + 2, W, 3 * P), jnp.float32)],
        compiler_params=pltpu.CompilerParams(
            dimension_semantics=("parallel", "parallel"),
            vmem_limit_bytes=vmem_limit),
        cost_estimate=pl.CostEstimate(
            flops=flops, transcendentals=0, bytes_accessed=bytes_accessed),
    )(x_nhwc, x_nhwc, x_nhwc, w1f, b1, w2r, b2, w3f, b3)
    return out2d.reshape(N, H, W, Cout)


# ----------------------------------------------------------------------------
# Full Bottleneck forward: NHWC in -> NHWC out (bf16), no boundary transposes.
# ----------------------------------------------------------------------------
@functools.partial(jax.jit, static_argnames=("th",))
def bottleneck_forward(x_nhwc, params, *, th=16):
    x = x_nhwc.astype(jnp.bfloat16)          # bf16 activation HBM I/O

    s1, sh1 = _fold_bn(params["g1"], params["b1"], params["m1"], params["v1"])
    s2, sh2 = _fold_bn(params["g2"], params["b2"], params["m2"], params["v2"])
    s3, sh3 = _fold_bn(params["g3"], params["b3"], params["m3"], params["v3"])

    planes = params["w1"].shape[1]
    # fold BN scale into conv weights in f32, then cast to bf16 for the MXU
    w1f = (params["w1"] * s1[None, :]).astype(jnp.bfloat16)
    w2f = params["w2"] * s2[None, None, None, :]                 # (3,3,P,P) f32
    w2r = w2f.reshape(3, 3 * planes, planes).astype(jnp.bfloat16)
    w3f = (params["w3"] * s3[None, :]).astype(jnp.bfloat16)

    return bottleneck_fused(
        x, w1f, sh1.reshape(1, -1), w2r, sh2.reshape(1, -1),
        w3f, sh3.reshape(1, -1), th=th)


def bottleneck_forward_nchw(x_nchw, params, *, th=16):
    """Drop-in adapter matching the PyTorch module's NCHW layout."""
    x = jnp.transpose(x_nchw, (0, 2, 3, 1))
    y = bottleneck_forward(x, params, th=th)
    return jnp.transpose(y, (0, 3, 1, 2))


# ----------------------------------------------------------------------------
# Pure-JAX f32 reference (same math, no Pallas) for verification (NHWC).
# ----------------------------------------------------------------------------
def reference_forward(x_nhwc, p):
    x = x_nhwc.astype(jnp.float32)

    def bn(y, g, be, m, v):
        return (y - m) / jnp.sqrt(v + EPS) * g + be

    y = jnp.einsum("nhwc,cd->nhwd", x, p["w1"])
    y = jax.nn.relu(bn(y, p["g1"], p["b1"], p["m1"], p["v1"]))
    y = jax.lax.conv_general_dilated(
        y, p["w2"], window_strides=(1, 1), padding="SAME",
        dimension_numbers=("NHWC", "HWIO", "NHWC"))
    y = jax.nn.relu(bn(y, p["g2"], p["b2"], p["m2"], p["v2"]))
    y = jnp.einsum("nhwc,cd->nhwd", y, p["w3"])
    y = bn(y, p["g3"], p["b3"], p["m3"], p["v3"]) + x
    return jax.nn.relu(y)


def make_params(key, inplanes, planes):
    ks = jax.random.split(key, 12)
    expansion = 4
    p = {
        # conv weights stored channels-last friendly:
        #   w1: (Cin, planes), w2: (3,3,planes,planes)=HWIO, w3: (planes, planes*4)
        "w1": jax.random.normal(ks[0], (inplanes, planes), jnp.float32) * 0.1,
        "w2": jax.random.normal(ks[1], (3, 3, planes, planes), jnp.float32) * 0.1,
        "w3": jax.random.normal(ks[2], (planes, planes * expansion), jnp.float32) * 0.1,
    }
    for i, c in zip((1, 2, 3), (planes, planes, planes * expansion)):
        p[f"g{i}"] = 1.0 + 0.1 * jax.random.normal(ks[2 + i], (c,), jnp.float32)
        p[f"b{i}"] = 0.1 * jax.random.normal(ks[5 + i], (c,), jnp.float32)
        p[f"m{i}"] = 0.05 * jax.random.normal(ks[8 + i], (c,), jnp.float32)
        p[f"v{i}"] = 1.0 + 0.1 * jax.nn.softplus(
            jax.random.normal(ks[(2 + i) % 12], (c,), jnp.float32))
    return p


if __name__ == "__main__":
    key = jax.random.PRNGKey(0)
    k_x, k_p = jax.random.split(key)

    # Small shapes: batch=2, inplanes=32 (= planes*expansion so the residual
    # add is valid with downsample=None), planes=8, spatial 16x16.
    # th=8 -> 2 row-bands per sample, exercising the in-kernel halo path.
    N, inplanes, planes, H, W = 2, 32, 8, 16, 16
    x = jax.random.normal(k_x, (N, H, W, inplanes), jnp.float32)   # NHWC input
    params = make_params(k_p, inplanes, planes)

    out = bottleneck_forward(x, params, th=8)
    out = jax.block_until_ready(out)

    ref = reference_forward(x, params)
    assert out.shape == (N, H, W, planes * 4), out.shape
    out_f32 = out.astype(jnp.float32)
    # bf16 activations/weights/output (f32 accumulation) -> relaxed tolerance.
    max_err = float(jnp.max(jnp.abs(out_f32 - ref)))
    assert jnp.allclose(out_f32, ref, rtol=6e-2, atol=6e-2), max_err

    print("KERNEL_OK")
</pallas_src>

<mosaic_0001>
module attributes {stable_mosaic.version = 11 : i64} {
  func.func @_bottleneck_kernel(%arg0: i32, %arg1: i32, %arg2: memref<1x8x16x32xbf16, #tpu.memory_space<vmem>>, %arg3: memref<1x1x16x32xbf16, #tpu.memory_space<vmem>>, %arg4: memref<1x1x16x32xbf16, #tpu.memory_space<vmem>>, %arg5: memref<32x8xbf16, #tpu.memory_space<vmem>>, %arg6: memref<1x8xf32, #tpu.memory_space<vmem>>, %arg7: memref<3x24x8xbf16, #tpu.memory_space<vmem>>, %arg8: memref<1x8xf32, #tpu.memory_space<vmem>>, %arg9: memref<8x32xbf16, #tpu.memory_space<vmem>>, %arg10: memref<1x32xf32, #tpu.memory_space<vmem>>, %arg11: memref<1x128x32xbf16, #tpu.memory_space<vmem>>, %arg12: memref<10x16x24xf32, #tpu.memory_space<vmem>>) attributes {dimension_semantics = [#tpu.dimension_semantics<parallel>, #tpu.dimension_semantics<parallel>], iteration_bounds = array<i64: 2, 2>, scalar_prefetch = 0 : i64, scratch_operands = 1 : i64, tpu.core_type = #tpu.core_type<tc>, window_params = [{transform_indices = @transform_0, window_bounds = array<i64: 1, 8, 16, 32>}, {transform_indices = @transform_1, window_bounds = array<i64: 1, 1, 16, 32>}, {transform_indices = @transform_2, window_bounds = array<i64: 1, 1, 16, 32>}, {pipeline_mode = #tpu.pipeline_mode<synchronous>, transform_indices = @transform_3, window_bounds = array<i64: 32, 8>}, {pipeline_mode = #tpu.pipeline_mode<synchronous>, transform_indices = @transform_4, window_bounds = array<i64: 1, 8>}, {pipeline_mode = #tpu.pipeline_mode<synchronous>, transform_indices = @transform_5, window_bounds = array<i64: 3, 24, 8>}, {pipeline_mode = #tpu.pipeline_mode<synchronous>, transform_indices = @transform_6, window_bounds = array<i64: 1, 8>}, {pipeline_mode = #tpu.pipeline_mode<synchronous>, transform_indices = @transform_7, window_bounds = array<i64: 8, 32>}, {pipeline_mode = #tpu.pipeline_mode<synchronous>, transform_indices = @transform_8, window_bounds = array<i64: 1, 32>}, {transform_indices = @transform_9, window_bounds = array<i64: 1, 128, 32>}]} {
    %c0 = arith.constant 0 : index
    %c0_0 = arith.constant 0 : index
    %c0_1 = arith.constant 0 : index
    %c0_2 = arith.constant 0 : index
    %0 = vector.load %arg2[%c0, %c0_0, %c0_1, %c0_2] : memref<1x8x16x32xbf16, #tpu.memory_space<vmem>>, vector<1x8x16x32xbf16>
    %1 = vector.shape_cast %0 : vector<1x8x16x32xbf16> to vector<8x16x32xbf16>
    %c0_3 = arith.constant 0 : index
    %c0_4 = arith.constant 0 : index
    %c0_5 = arith.constant 0 : index
    %c0_6 = arith.constant 0 : index
    %2 = vector.load %arg3[%c0_3, %c0_4, %c0_5, %c0_6] : memref<1x1x16x32xbf16, #tpu.memory_space<vmem>>, vector<1x1x16x32xbf16>
    %3 = vector.shape_cast %2 : vector<1x1x16x32xbf16> to vector<16x32xbf16>
    %c0_7 = arith.constant 0 : index
    %c0_8 = arith.constant 0 : index
    %c0_9 = arith.constant 0 : index
    %c0_10 = arith.constant 0 : index
    %4 = vector.load %arg4[%c0_7, %c0_8, %c0_9, %c0_10] : memref<1x1x16x32xbf16, #tpu.memory_space<vmem>>, vector<1x1x16x32xbf16>
    %5 = vector.shape_cast %4 : vector<1x1x16x32xbf16> to vector<16x32xbf16>
    %6 = vector.shape_cast %1 : vector<8x16x32xbf16> to vector<128x32xbf16>
    %7 = tpu.concatenate %3, %6, %5 in 0 : vector<16x32xbf16>, vector<128x32xbf16>, vector<16x32xbf16> -> vector<160x32xbf16>
    %c0_11 = arith.constant 0 : index
    %c0_12 = arith.constant 0 : index
    %8 = vector.load %arg5[%c0_11, %c0_12] : memref<32x8xbf16, #tpu.memory_space<vmem>>, vector<32x8xbf16>
    %cst = arith.constant dense<0.000000e+00> : vector<160x8xf32>
    %9 = tpu.matmul %7, %8, %cst {dimension_numbers = #tpu.dot_dimension_numbers<[1], [0], [0], [1], [0, 0, 1, 1], [], []>} : vector<160x32xbf16>, vector<32x8xbf16>, vector<160x8xf32> -> vector<160x8xf32>
    %c0_13 = arith.constant 0 : index
    %c0_14 = arith.constant 0 : index
    %10 = vector.load %arg6[%c0_13, %c0_14] : memref<1x8xf32, #tpu.memory_space<vmem>>, vector<1x8xf32>
    %11 = vector.broadcast %10 : vector<1x8xf32> to vector<160x8xf32>
    %12 = arith.addf %9, %11 : vector<160x8xf32>
    %cst_15 = arith.constant 0.000000e+00 : f32
    %13 = vector.broadcast %cst_15 : f32 to vector<160x8xf32>
    %14 = arith.maximumf %12, %13 : vector<160x8xf32>
    %15 = vector.shape_cast %14 : vector<160x8xf32> to vector<10x16x8xf32>
    %cst_16 = arith.constant 0.000000e+00 : f32
    %16 = vector.broadcast %cst_16 : f32 to vector<10x1x8xf32>
    %c0_17 = arith.constant 0 : index
    %c0_18 = arith.constant 0 : index
    %c8 = arith.constant 8 : index
    %17 = vector.load %arg12[%c0_17, %c0_18, %c8] : memref<10x16x24xf32, #tpu.memory_space<vmem>>, vector<10x16x8xf32>
    tpu.vector_store %arg12[%c0_17, %c0_18, %c8], %15 {strides = array<i32>} : memref<10x16x24xf32, #tpu.memory_space<vmem>>, vector<10x16x8xf32>,
    %18 = vector.extract_strided_slice %15 {offsets = [0, 0, 0], sizes = [10, 15, 8], strides = [1, 1, 1]} : vector<10x16x8xf32> to vector<10x15x8xf32>
    %c0_19 = arith.constant 0 : index
    %c1 = arith.constant 1 : index
    %c0_20 = arith.constant 0 : index
    %19 = vector.load %arg12[%c0_19, %c1, %c0_20] : memref<10x16x24xf32, #tpu.memory_space<vmem>>, vector<10x15x8xf32>
    tpu.vector_store %arg12[%c0_19, %c1, %c0_20], %18 {strides = array<i32>} : memref<10x16x24xf32, #tpu.memory_space<vmem>>, vector<10x15x8xf32>,
    %c0_21 = arith.constant 0 : index
    %c0_22 = arith.constant 0 : index
    %c0_23 = arith.constant 0 : index
    %20 = vector.load %arg12[%c0_21, %c0_22, %c0_23] : memref<10x16x24xf32, #tpu.memory_space<vmem>>, vector<10x1x8xf32>
    tpu.vector_store %arg12[%c0_21, %c0_22, %c0_23], %16 {strides = array<i32>} : memref<10x16x24xf32, #tpu.memory_space<vmem>>, vector<10x1x8xf32>,
    %21 = vector.extract_strided_slice %15 {offsets = [0, 1, 0], sizes = [10, 15, 8], strides = [1, 1, 1]} : vector<10x16x8xf32> to vector<10x15x8xf32>
    %c0_24 = arith.constant 0 : index
    %c0_25 = arith.constant 0 : index
    %c16 = arith.constant 16 : index
    %22 = vector.load %arg12[%c0_24, %c0_25, %c16] : memref<10x16x24xf32, #tpu.memory_space<vmem>>, vector<10x15x8xf32>
    tpu.vector_store %arg12[%c0_24, %c0_25, %c16], %21 {strides = array<i32>} : memref<10x16x24xf32, #tpu.memory_space<vmem>>, vector<10x15x8xf32>,
    %c0_26 = arith.constant 0 : index
    %c15 = arith.constant 15 : index
    %c16_27 = arith.constant 16 : index
    %23 = vector.load %arg12[%c0_26, %c15, %c16_27] : memref<10x16x24xf32, #tpu.memory_space<vmem>>, vector<10x1x8xf32>
    tpu.vector_store %arg12[%c0_26, %c15, %c16_27], %16 {strides = array<i32>} : memref<10x16x24xf32, #tpu.memory_space<vmem>>, vector<10x1x8xf32>,
    %c0_i32 = arith.constant 0 : i32
    %24 = arith.cmpi eq, %arg1, %c0_i32 : i32
    %25 = arith.extui %24 : i1 to i32
    %c0_i32_28 = arith.constant 0 : i32
    %26 = arith.cmpi ne, %25, %c0_i32_28 : i32
    scf.if %26 {
      %cst_63 = arith.constant 0.000000e+00 : f32
      %72 = vector.broadcast %cst_63 : f32 to vector<16x24xf32>
      %c0_64 = arith.constant 0 : index
      %c0_65 = arith.constant 0 : index
      %c0_66 = arith.constant 0 : index
      %73 = vector.load %arg12[%c0_64, %c0_65, %c0_66] : memref<10x16x24xf32, #tpu.memory_space<vmem>>, vector<1x16x24xf32>
      %74 = vector.shape_cast %73 : vector<1x16x24xf32> to vector<16x24xf32>
      %75 = vector.shape_cast %72 : vector<16x24xf32> to vector<1x16x24xf32>
      tpu.vector_store %arg12[%c0_64, %c0_65, %c0_66], %75 {strides = array<i32>} : memref<10x16x24xf32, #tpu.memory_space<vmem>>, vector<1x16x24xf32>,
    } else {
    }
    %c1_i32 = arith.constant 1 : i32
    %27 = arith.cmpi eq, %arg1, %c1_i32 : i32
    %28 = arith.extui %27 : i1 to i32
    %c0_i32_29 = arith.constant 0 : i32
    %29 = arith.cmpi ne, %28, %c0_i32_29 : i32
    scf.if %29 {
      %cst_63 = arith.constant 0.000000e+00 : f32
      %72 = vector.broadcast %cst_63 : f32 to vector<16x24xf32>
      %c9 = arith.constant 9 : index
      %c0_64 = arith.constant 0 : index
      %c0_65 = arith.constant 0 : index
      %73 = vector.load %arg12[%c9, %c0_64, %c0_65] : memref<10x16x24xf32, #tpu.memory_space<vmem>>, vector<1x16x24xf32>
      %74 = vector.shape_cast %73 : vector<1x16x24xf32> to vector<16x24xf32>
      %75 = vector.shape_cast %72 : vector<16x24xf32> to vector<1x16x24xf32>
      tpu.vector_store %arg12[%c9, %c0_64, %c0_65], %75 {strides = array<i32>} : memref<10x16x24xf32, #tpu.memory_space<vmem>>, vector<1x16x24xf32>,
    } else {
    }
    %cst_30 = arith.constant 0.000000e+00 : f32
    %30 = vector.broadcast %cst_30 : f32 to vector<128x8xf32>
    %c0_31 = arith.constant 0 : index
    %c0_32 = arith.constant 0 : index
    %c0_33 = arith.constant 0 : index
    %31 = vector.load %arg12[%c0_31, %c0_32, %c0_33] : memref<10x16x24xf32, #tpu.memory_space<vmem>>, vector<8x16x24xf32>
    %32 = vector.shape_cast %31 : vector<8x16x24xf32> to vector<128x24xf32>
    %33 = arith.truncf %32 : vector<128x24xf32> to vector<128x24xbf16>
    %c0_34 = arith.constant 0 : index
    %c0_35 = arith.constant 0 : index
    %c0_36 = arith.constant 0 : index
    %34 = vector.load %arg7[%c0_34, %c0_35, %c0_36] : memref<3x24x8xbf16, #tpu.memory_space<vmem>>, vector<1x24x8xbf16>
    %35 = vector.shape_cast %34 : vector<1x24x8xbf16> to vector<24x8xbf16>
    %cst_37 = arith.constant dense<0.000000e+00> : vector<128x8xf32>
    %36 = tpu.matmul %33, %35, %cst_37 {dimension_numbers = #tpu.dot_dimension_numbers<[1], [0], [0], [1], [0, 0, 1, 1], [], []>} : vector<128x24xbf16>, vector<24x8xbf16>, vector<128x8xf32> -> vector<128x8xf32>
    %37 = arith.addf %30, %36 : vector<128x8xf32>
    %c1_38 = arith.constant 1 : index
    %c0_39 = arith.constant 0 : index
    %c0_40 = arith.constant 0 : index
    %38 = vector.load %arg12[%c1_38, %c0_39, %c0_40] : memref<10x16x24xf32, #tpu.memory_space<vmem>>, vector<8x16x24xf32>
    %39 = vector.shape_cast %38 : vector<8x16x24xf32> to vector<128x24xf32>
    %40 = arith.truncf %39 : vector<128x24xf32> to vector<128x24xbf16>
    %c1_41 = arith.constant 1 : index
    %c0_42 = arith.constant 0 : index
    %c0_43 = arith.constant 0 : index
    %41 = vector.load %arg7[%c1_41, %c0_42, %c0_43] : memref<3x24x8xbf16, #tpu.memory_space<vmem>>, vector<1x24x8xbf16>
    %42 = vector.shape_cast %41 : vector<1x24x8xbf16> to vector<24x8xbf16>
    %cst_44 = arith.constant dense<0.000000e+00> : vector<128x8xf32>
    %43 = tpu.matmul %40, %42, %cst_44 {dimension_numbers = #tpu.dot_dimension_numbers<[1], [0], [0], [1], [0, 0, 1, 1], [], []>} : vector<128x24xbf16>, vector<24x8xbf16>, vector<128x8xf32> -> vector<128x8xf32>
    %44 = arith.addf %37, %43 : vector<128x8xf32>
    %c2 = arith.constant 2 : index
    %c0_45 = arith.constant 0 : index
    %c0_46 = arith.constant 0 : index
    %45 = vector.load %arg12[%c2, %c0_45, %c0_46] : memref<10x16x24xf32, #tpu.memory_space<vmem>>, vector<8x16x24xf32>
    %46 = vector.shape_cast %45 : vector<8x16x24xf32> to vector<128x24xf32>
    %47 = arith.truncf %46 : vector<128x24xf32> to vector<128x24xbf16>
    %c2_47 = arith.constant 2 : index
    %c0_48 = arith.constant 0 : index
    %c0_49 = arith.constant 0 : index
    %48 = vector.load %arg7[%c2_47, %c0_48, %c0_49] : memref<3x24x8xbf16, #tpu.memory_space<vmem>>, vector<1x24x8xbf16>
    %49 = vector.shape_cast %48 : vector<1x24x8xbf16> to vector<24x8xbf16>
    %cst_50 = arith.constant dense<0.000000e+00> : vector<128x8xf32>
    %50 = tpu.matmul %47, %49, %cst_50 {dimension_numbers = #tpu.dot_dimension_numbers<[1], [0], [0], [1], [0, 0, 1, 1], [], []>} : vector<128x24xbf16>, vector<24x8xbf16>, vector<128x8xf32> -> vector<128x8xf32>
    %51 = arith.addf %44, %50 : vector<128x8xf32>
    %c0_51 = arith.constant 0 : index
    %c0_52 = arith.constant 0 : index
    %52 = vector.load %arg8[%c0_51, %c0_52] : memref<1x8xf32, #tpu.memory_space<vmem>>, vector<1x8xf32>
    %53 = vector.broadcast %52 : vector<1x8xf32> to vector<128x8xf32>
    %54 = arith.addf %51, %53 : vector<128x8xf32>
    %cst_53 = arith.constant 0.000000e+00 : f32
    %55 = vector.broadcast %cst_53 : f32 to vector<128x8xf32>
    %56 = arith.maximumf %54, %55 : vector<128x8xf32>
    %57 = arith.truncf %56 : vector<128x8xf32> to vector<128x8xbf16>
    %c0_54 = arith.constant 0 : index
    %c0_55 = arith.constant 0 : index
    %58 = vector.load %arg9[%c0_54, %c0_55] : memref<8x32xbf16, #tpu.memory_space<vmem>>, vector<8x32xbf16>
    %cst_56 = arith.constant dense<0.000000e+00> : vector<128x32xf32>
    %59 = tpu.matmul %57, %58, %cst_56 {dimension_numbers = #tpu.dot_dimension_numbers<[1], [0], [0], [1], [0, 0, 1, 1], [], []>} : vector<128x8xbf16>, vector<8x32xbf16>, vector<128x32xf32> -> vector<128x32xf32>
    %c0_57 = arith.constant 0 : index
    %c0_58 = arith.constant 0 : index
    %60 = vector.load %arg10[%c0_57, %c0_58] : memref<1x32xf32, #tpu.memory_space<vmem>>, vector<1x32xf32>
    %61 = vector.broadcast %60 : vector<1x32xf32> to vector<128x32xf32>
    %62 = arith.addf %59, %61 : vector<128x32xf32>
    %63 = vector.shape_cast %1 : vector<8x16x32xbf16> to vector<128x32xbf16>
    %64 = arith.extf %63 : vector<128x32xbf16> to vector<128x32xf32>
    %65 = arith.addf %62, %64 : vector<128x32xf32>
    %cst_59 = arith.constant 0.000000e+00 : f32
    %66 = vector.broadcast %cst_59 : f32 to vector<128x32xf32>
    %67 = arith.maximumf %65, %66 : vector<128x32xf32>
    %68 = arith.truncf %67 : vector<128x32xf32> to vector<128x32xbf16>
    %c0_60 = arith.constant 0 : index
    %c0_61 = arith.constant 0 : index
    %c0_62 = arith.constant 0 : index
    %69 = vector.load %arg11[%c0_60, %c0_61, %c0_62] : memref<1x128x32xbf16, #tpu.memory_space<vmem>>, vector<1x128x32xbf16>
    %70 = vector.shape_cast %69 : vector<1x128x32xbf16> to vector<128x32xbf16>
    %71 = vector.shape_cast %68 : vector<128x32xbf16> to vector<1x128x32xbf16>
    tpu.vector_store %arg11[%c0_60, %c0_61, %c0_62], %71 {strides = array<i32>} : memref<1x128x32xbf16, #tpu.memory_space<vmem>>, vector<1x128x32xbf16>,
    return
  }
  func.func @transform_0(%arg0: i32, %arg1: i32) -> (i32, i32, i32, i32) {
    %c0_i32 = arith.constant 0 : i32
    %c0_i32_0 = arith.constant 0 : i32
    %c0_i32_1 = arith.constant 0 : i32
    return %arg0, %arg1, %c0_i32, %c0_i32_0 : i32, i32, i32, i32
  }
  func.func @transform_1(%arg0: i32, %arg1: i32) -> (i32, i32, i32, i32) {
    %c8_i32 = arith.constant 8 : i32
    %0 = arith.muli %arg1, %c8_i32 : i32
    %c1_i32 = arith.constant 1 : i32
    %1 = arith.subi %0, %c1_i32 : i32
    %c0_i32 = arith.constant 0 : i32
    %2 = arith.maxsi %1, %c0_i32 : i32
    %c0_i32_0 = arith.constant 0 : i32
    %c0_i32_1 = arith.constant 0 : i32
    %c0_i32_2 = arith.constant 0 : i32
    return %arg0, %2, %c0_i32_0, %c0_i32_1 : i32, i32, i32, i32
  }
  func.func @transform_2(%arg0: i32, %arg1: i32) -> (i32, i32, i32, i32) {
    %c1_i32 = arith.constant 1 : i32
    %0 = arith.addi %arg1, %c1_i32 : i32
    %c8_i32 = arith.constant 8 : i32
    %1 = arith.muli %0, %c8_i32 : i32
    %c15_i32 = arith.constant 15 : i32
    %2 = arith.minsi %1, %c15_i32 : i32
    %c0_i32 = arith.constant 0 : i32
    %c0_i32_0 = arith.constant 0 : i32
    %c0_i32_1 = arith.constant 0 : i32
    return %arg0, %2, %c0_i32, %c0_i32_0 : i32, i32, i32, i32
  }
  func.func @transform_3(%arg0: i32, %arg1: i32) -> (i32, i32) {
    %c0_i32 = arith.constant 0 : i32
    %c0_i32_0 = arith.constant 0 : i32
    %c0_i32_1 = arith.constant 0 : i32
    return %c0_i32, %c0_i32_0 : i32, i32
  }
  func.func @transform_4(%arg0: i32, %arg1: i32) -> (i32, i32) {
    %c0_i32 = arith.constant 0 : i32
    %c0_i32_0 = arith.constant 0 : i32
    %c0_i32_1 = arith.constant 0 : i32
    return %c0_i32, %c0_i32_0 : i32, i32
  }
  func.func @transform_5(%arg0: i32, %arg1: i32) -> (i32, i32, i32) {
    %c0_i32 = arith.constant 0 : i32
    %c0_i32_0 = arith.constant 0 : i32
    %c0_i32_1 = arith.constant 0 : i32
    %c0_i32_2 = arith.constant 0 : i32
    return %c0_i32, %c0_i32_0, %c0_i32_1 : i32, i32, i32
  }
  func.func @transform_6(%arg0: i32, %arg1: i32) -> (i32, i32) {
    %c0_i32 = arith.constant 0 : i32
    %c0_i32_0 = arith.constant 0 : i32
    %c0_i32_1 = arith.constant 0 : i32
    return %c0_i32, %c0_i32_0 : i32, i32
  }
  func.func @transform_7(%arg0: i32, %arg1: i32) -> (i32, i32) {
    %c0_i32 = arith.constant 0 : i32
    %c0_i32_0 = arith.constant 0 : i32
    %c0_i32_1 = arith.constant 0 : i32
    return %c0_i32, %c0_i32_0 : i32, i32
  }
  func.func @transform_8(%arg0: i32, %arg1: i32) -> (i32, i32) {
    %c0_i32 = arith.constant 0 : i32
    %c0_i32_0 = arith.constant 0 : i32
    %c0_i32_1 = arith.constant 0 : i32
    return %c0_i32, %c0_i32_0 : i32, i32
  }
  func.func @transform_9(%arg0: i32, %arg1: i32) -> (i32, i32, i32) {
    %c0_i32 = arith.constant 0 : i32
    %c0_i32_0 = arith.constant 0 : i32
    return %arg0, %arg1, %c0_i32 : i32, i32, i32
  }
}

</mosaic_0001>

<bundles_post_ra>
// kernel: bottleneck_forward.1
= control target key start
LH: loop header
LB: loop body
LE: loop exit
PB: predicated region body
PF: predicated region fallthrough
CT: control target
= control target key end

     0   :  { %s3140_s0 = inlined_call_operand.vmem [shape: bf16[2,16,16,32], index: 0, kind: input, shape index: {}, may-alias: {0,1,2}]   ;;  %s3141_s1 = inlined_call_operand.vmem [shape: bf16[2,16,16,32], index: 1, kind: input, shape index: {}, may-alias: {0,1,2}]   ;;  %s3142_s2 = inlined_call_operand.vmem [shape: bf16[2,16,16,32], index: 2, kind: input, shape index: {}, may-alias: {0,1,2}]   ;;  %s3143_s3 = inlined_call_operand.vmem [shape: bf16[32,8], index: 3, kind: input, shape index: {}]   ;;  %s3144_s4 = inlined_call_operand.vmem [shape: f32[1,8], index: 4, kind: input, shape index: {}]   ;;  %s3145_s5 = inlined_call_operand.vmem [shape: bf16[3,24,8], index: 5, kind: input, shape index: {}]   ;;  %s3146_s6 = inlined_call_operand.vmem [shape: f32[1,8], index: 6, kind: input, shape index: {}]   ;;  %s3147_s7 = inlined_call_operand.vmem [shape: bf16[8,32], index: 7, kind: input, shape index: {}]   ;;  %s3148_s8 = inlined_call_operand.vmem [shape: f32[1,32], index: 8, kind: input, shape index: {}]   ;;  %s3149_s9 = inlined_call_operand.hbm [shape: bf16[2,256,32], index: 9, kind: output, shape index: {}]  }
   0x1   :  { %3158 = sst [smem:[#allocation14_spill]] %s3143_s3 }
   0x2   :  { %14 = vsyncpa [#allocation4], 0 }
   0x3   :  { %16 = vsyncpa [#allocation4 + $0x1], 0  ;;  %s2544_s30 = smov 0   ;;  %s2546_s10 = smov 0  }
   0x4   :  { %s2548_s11 = smov 0   ;;  %s2550_s12 = smov 0  }
   0x5   :  { %s2552_s13 = smov 0   ;;  %s2554_s14 = smov 0  }
   0x6   :  { %s2556_s15 = smov 0   ;;  %s2558_s16 = smov 0  }
   0x7 LB: > { %3159 = sst [smem:[#allocation6_spill]] %s2456_s30  ;;  %s1942_s17 = sadd.s32 4294967295, %s2484_s16   ;;  %s2484_s16 = sphi %s2558_s16, %s22_s16   ;;  %s2480_s15 = sphi %s2556_s15, %s3178_s15   ;;  %s2476_s14 = sphi %s2554_s14, %s3177_s14   ;;  %s2472_s13 = sphi %s2552_s13, %s3176_s13   ;;  %s2468_s12 = sphi %s2550_s12, %s3175_s12   ;;  %s2464_s11 = sphi %s2548_s11, %s3174_s11   ;;  %s2460_s10 = sphi %s2546_s10, %s3180_s10   ;;  %s2456_s30 = sphi %s2544_s30, %s3179_s30  }
   0x8   : > { %3160 = sst [smem:[#allocation7_spill]] %s2464_s11  ;;  %s1943_s18 = sadd.s32 4294967294, %s2484_s16  }
   0x9   : > { %3161 = sst [smem:[#allocation8_spill]] %s2476_s14  ;;  %s31_s19 = sadd.s32 1, %s2476_s14 }
   0xa   : > { %3162 = sst [smem:[#allocation9_spill]] %s2480_s15  ;;  %p32_p0 = scmp.ge.s32.totalorder %s31_s19, 2 }
   0xb   : > { %s34_s20 = sadd.s32 1, %s2480_s15  ;;  %p279_p1 = scmp.ne.s32.totalorder %s2464_s11, %s2460_s10 }
   0xc   : > { %p280_p2 = scmp.eq.s32.totalorder %s1942_s17, 3  ;;  %s3182_s19 = smov (%p32_p0, %s31_s19), 0 }
   0xd   : > { %3163 = sst [smem:[#allocation10_spill]] %s3182_s19  ;;  %s3184_s20 = smov (!%p32_p0, %s34_s20), %s2480_s15 }
   0xe   : > { %s265_s21 = ssub.s32 %s2476_s14, %s3182_s19  ;;  %p2595_p3 = por %p280_p2, %p279_p1 }
   0xf   : > { %p36_p4 = scmp.ge.s32.totalorder %s3184_s20, 2  ;;  %p285_p5 = scmp.ne.s32.totalorder %s2460_s10, %s2456_s30 }
  0x10   : > { %p286_p6 = scmp.eq.s32.totalorder %s1943_s18, 3  ;;  %p1952_p7 = scmp.ge.s32.totalorder %s2484_s16, 1 }
  0x11   : > { %s3186_s20 = smov (%p36_p4, %s3184_s20), 0  ;;  %p376_p9 = scmp.lt.s32.totalorder %s2484_s16, 5 }
  0x12   : > { %3165 = sst [smem:[#allocation11_spill]] %s3186_s20  ;;  %p2604_p8 = por %p286_p6, %p285_p5 }
  0x13   : > { %s264_s24 = ssub.s32 %s2480_s15, %s3186_s20  ;;  %s269_s25 = sadd.s32 1, %s2464_s11 }
  0x14   : > { %s3166_s23 = scalar_select %p2604_p8, 1, 0 }
  0x15   : > { %s266_s26 = sor.u32 %s265_s21, %s264_s24  ;;  %p377_p10 = pnand %p1952_p7, %p376_p9 }
  0x16   : > { %3167 = sst [smem:[#allocation12_spill]] %s3166_s23  ;;  %p267_p11 = scmp.eq.s32.totalorder %s266_s26, 0  ;;  %vm583_vm0 = vcmask (!%p377_p10), 261120   ;;  %v2675_v12 = vld [vmem:[%s3144_s4] ss:$0 sm:$0xff] (!%p377_p10)  ;;  %vm827_vm1 = vcmask (!%p377_p10), 130112  }
  0x17   : > { %380 = sbr.rel (%p377_p10) target bundleno = 1011 (0x3f3), region = 56  ;;  %s3152_s28 = sand.u32 (!%p377_p10), 1, %s2460_s10   ;;  %vm870_vm2 = vcmask (!%p377_p10), 57344   ;;  %vm848_vm3 = vcmask (!%p377_p10), 64512   ;;  %vm850_vm4 = vcmask (!%p377_p10), 63488   ;;  %vm941_vm5 = vcmask (!%p377_p10), 195713  }
  0x18   : > { %s2613_s27 = scalar_select %p267_p11, %s2464_s11, %s269_s25  }
  0x19   : > { %s3169_s3 = sld [smem:[#allocation14_spill]] (!%p377_p10)  ;;  %s2621_s18 = sshll.u32 (!%p377_p10), %s3152_s28, 6  ;;  %vm963_vm6 = vcmask (!%p377_p10), 188544   ;;  %vm943_vm7 = vcmask (!%p377_p10), 195712  }
  0x1a   : > { %3168 = sst [smem:[#allocation13_spill]] %s2613_s27  ;;  %s1954_s24 = sshll.u32 (!%p377_p10), %s2468_s12, 3 }
  0x1b   : > { %p444_p12 = scmp.lt.s32.totalorder (!%p377_p10), %s2472_s13, 1  ;;  %p446_p13 = scmp.lt.s32.totalorder (!%p377_p10), %s1954_s24, 15 }
  0x1c   : > { %s1959_s25 = sadd.s32 (!%p377_p10), 4294967295, %s1954_s24  ;;  %s2075_s26 = sadd.s32 (!%p377_p10), 8, %s1954_s24 }
  0x1d   : > { %p456_p0 = scmp.gt.s32.totalorder (!%p377_p10), %s1959_s25, 0  ;;  %p473_p1 = scmp.lt.s32.totalorder (!%p377_p10), %s2075_s26, 15 }
  0x1e   : > { %s445_s19 = scalar_select %p444_p12, %s2472_s13, 1 }
  0x1f   : > { %v2364_v0 = vld [vmem:[%s3169_s3] sm:$0xff]   ;;  %v2365_v1 = vld [vmem:[%s3169_s3 + $0x8] sm:$0xff]   ;;  %s3188_s24 = smov (!%p446_p13, %s1954_s24), 15  ;;  %p1960_p2 = scmp.lt.s32.totalorder %s1959_s25, 15 }
  0x20   : > { %2143 = vmatprep.subr.bf16.mxu0 %v2364_v0  ;;  %s1956_s29 = sshll.u32 %s445_s19, 5  ;;  %s1955_s17 = sshll.u32 %s3188_s24, 1 }
  0x21   : > { %2144 = vmatpush3.bf16.msra.mxu0 %v2364_v0  ;;  %s450_s28 = sadd.s32 %s1956_s29, %s1955_s17  ;;  %s3190_s25 = smov (!%p456_p0, %s1959_s25), 0 }
  0x22   : > { %2145 = vmatprep.subr.bf16.mxu0 %v2365_v1  ;;  %s1957_s15 = sshll.u32 %s450_s28, 2  ;;  %s3192_s26 = smov (!%p473_p1, %s2075_s26), 15 }
  0x23   : > { %s452_s3 = scalar_lea.vmem %s3140_s0, %s1957_s15  ;;  %s3194_s25 = smov (!%p1960_p2, %s3190_s25), 15 }
  0x24   : > { %s3196_s26 = smov (!%p473_p1, %s3192_s26), 15  ;;  %s1965_s14 = sshll.u32 %s3194_s25, 1  ;;  %v2632_v2 = vld [vmem:[%s452_s3] sm:$0xff]   ;;  %v2634_v3 = vld [vmem:[%s452_s3 + $0x8] sm:$0xff]   ;;  %v2647_v5 = vld [vmem:[%s452_s3 + $0x10] sm:$0xff]  }
  0x25   : > { %2146 = vmatpush3.bf16.msra.mxu0 %v2365_v1  ;;  %s464_s27 = sadd.s32 %s1965_s14, %s1956_s29  ;;  %s1972_s11 = sshll.u32 %s3196_s26, 1  ;;  %v2649_v6 = vld [vmem:[%s452_s3 + $0x18] sm:$0xff]   ;;  %v2655_v7 = vld [vmem:[%s452_s3 + $0x20] sm:$0xff]   ;;  %v2657_v8 = vld [vmem:[%s452_s3 + $0x28] sm:$0xff]  }
  0x26   : > { %s1967_s19 = sshll.u32 %s464_s27, 2  ;;  %s481_s24 = sadd.s32 %s1972_s11, %s1956_s29  ;;  %v2663_v9 = vld [vmem:[%s452_s3 + $0x30] sm:$0xff]   ;;  %v2665_v10 = vld [vmem:[%s452_s3 + $0x38] sm:$0xff]  }
  0x27   : > { %s466_s23 = scalar_lea.vmem %s3141_s1, %s1967_s19  ;;  %s1974_s30 = sshll.u32 %s481_s24, 2 }
  0x28   : > { %s483_s21 = scalar_lea.vmem %s3142_s2, %s1974_s30  ;;  %v2366_v4 = vld [vmem:[%s466_s23] sm:$0xff]   ;;  %s2486_s3 = smov 16  }
  0x29   : > { %2147 = vmatprep.mubr.msk.bf16.mxu0 %vm583_vm0, %v2366_v4  ;;  %v2375_v11 = vld [vmem:[%s483_s21] sm:$0xff]   ;;  %s2487_s14 = smov 8   ;;  %s2938_s23 = scalar_lea.vmem [#allocation3], %s2621_s18 }
  0x2a   : > { %2148 = vmatmul.mubr.msk.bf16.vlgmr.msra.gmra.mrb[0].mxu0 %vm583_vm0, %v2632_v2  ;;  %p1998_p4 = scmp.ne.s32.totalorder %s2468_s12, 0 }
  0x2b   : > { %2151 = vmatprep.mubr.msk.bf16.mxu0 %vm583_vm0, %v2634_v3  ;;  %vm978_vm8 = vcmask (!%p1998_p4), 195584  }
  0x32   : > { %2152 = vmatmul.mubr.msk.bf16.gmra.mrb[4].mxu0 %vm583_vm0, %v2647_v5 }
  0x33   : > { %2155 = vmatprep.mubr.msk.bf16.mxu0 %vm583_vm0, %v2649_v6 }
  0x3a   : > { %2156 = vmatmul.mubr.msk.bf16.gmra.mrb[8].mxu0 %vm583_vm0, %v2655_v7 }
  0x3b   : > { %2159 = vmatprep.mubr.msk.bf16.mxu0 %vm583_vm0, %v2657_v8 }
  0x42   : > { %2160 = vmatmul.mubr.msk.bf16.gmra.mrb[12].mxu0 %vm583_vm0, %v2663_v9 }
  0x43   : > { %2163 = vmatprep.mubr.msk.bf16.mxu0 %vm583_vm0, %v2665_v10 }
  0x4a   : > { %2164 = vmatmul.mubr.msk.bf16.gmra.mrb[16].mxu0 %vm583_vm0, %v2375_v11 }
  0xfd   : > { %v2149_v13 = vpop.f32.mrb[0].mxu0 }
  0xfe   : > { %v657_v14 = vadd.f32 %v2149_v13, %v2675_v12  ;;  %v648_v15 = vpop.f32.mrb[1].mxu0 }
  0xff   : > { %v2150_v16 = vpop.f32.mrb[2].mxu0  ;;  %v649_v18 = vadd.f32 %v2675_v12, %v648_v15 }
 0x100   : > { %v2678_v17 = vmax.f32 %v657_v14, 0.0  ;;  %v660_v19 = vadd.f32 %v2150_v16, %v2675_v12  ;;  %v651_v20 = vpop.f32.mrb[3].mxu0 }
 0x101   : > { %v2686_v21 = vmax.f32 %v649_v18, 0.0  ;;  %v652_v26 = vadd.f32 %v2675_v12, %v651_v20  ;;  %v2488_v20 = vmov 0.0  }
 0x102   : > { %885 = vrot.lane.b32.xlu0 %v2678_v17, %s2486_s3  ;;  %771 = vrot.lane.b32.xlu1 %v2678_v17, %s2487_s14  ;;  %v2688_v22 = vmax.f32 %v660_v19, 0.0 }
 0x103   : > { %v2699_v28 = vmax.f32 %v652_v26, 0.0 }
 0x105   : > { %v2153_v23 = vpop.f32.mrb[4].mxu0 }
 0x106   : > { %773 = vrot.lane.b32.xlu1 %v2688_v22, %s2487_s14  ;;  %767 = vrot.lane.b32.xlu0 %v2686_v21, %s2487_s14  ;;  %v664_v24 = vpop.f32.mrb[5].mxu0  ;;  %v673_v29 = vadd.f32 %v2153_v23, %v2675_v12 }
 0x107   : > { %v2154_v25 = vpop.f32.mrb[6].mxu0  ;;  %v665_v37 = vadd.f32 %v2675_v12, %v664_v24 }
 0x108   : > { %v667_v27 = vpop.f32.mrb[7].mxu0  ;;  %v676_v30 = vadd.f32 %v2154_v25, %v2675_v12  ;;  %v2707_v34 = vmax.f32 %v673_v29, 0.0 }
 0x109   : > { %v668_v38 = vadd.f32 %v2675_v12, %v667_v27  ;;  %v2721_v42 = vmax.f32 %v665_v37, 0.0 }
 0x10a   : > { %887 = vrot.lane.b32.xlu1 %v2688_v22, %s2486_s3  ;;  %881 = vrot.lane.b32.xlu0 %v2686_v21, %s2486_s3  ;;  %v2709_v35 = vmax.f32 %v676_v30, 0.0 }
 0x10b   : > { %v2723_v43 = vmax.f32 %v668_v38, 0.0 }
 0x10d   : > { %v2157_v31 = vpop.f32.mrb[8].mxu0 }
 0x10e   : > { %883 = vrot.lane.b32.xlu1 %v2699_v28, %s2486_s3  ;;  %769 = vrot.lane.b32.xlu0 %v2699_v28, %s2487_s14  ;;  %v680_v32 = vpop.f32.mrb[9].mxu0  ;;  %v689_v45 = vadd.f32 %v2157_v31, %v2675_v12 }
 0x10f   : > { %v2158_v33 = vpop.f32.mrb[10].mxu0  ;;  %v681_v57 = vadd.f32 %v2675_v12, %v680_v32 }
 0x110   : > { %v683_v36 = vpop.f32.mrb[11].mxu0  ;;  %v692_v46 = vadd.f32 %v2158_v33, %v2675_v12  ;;  %v2737_v52 = vmax.f32 %v689_v45, 0.0 }
 0x111   : > { %v684_v58 = vadd.f32 %v2675_v12, %v683_v36  ;;  %v2753_v59 = vmax.f32 %v681_v57, 0.0 }
 0x112   : > { %781 = vrot.lane.b32.xlu1 %v2709_v35, %s2487_s14  ;;  %779 = vrot.lane.b32.xlu0 %v2707_v34, %s2487_s14  ;;  %v2739_v53 = vmax.f32 %v692_v46, 0.0 }
 0x113   : > { %v2755_v60 = vmax.f32 %v684_v58, 0.0  ;;  %v2489_v58 = vmov (!%p1998_p4), 0.0  }
 0x115   : > { %v2161_v39 = vpop.f32.mrb[12].mxu0 }
 0x116   : > { %895 = vrot.lane.b32.xlu1 %v2709_v35, %s2486_s3  ;;  %893 = vrot.lane.b32.xlu0 %v2707_v34, %s2486_s3  ;;  %v696_v40 = vpop.f32.mrb[13].mxu0  ;;  %v705_v61 = vadd.f32 %v2161_v39, %v2675_v12 }
 0x117   : > { %v2162_v41 = vpop.f32.mrb[14].mxu0  ;;  %v697_v1 = vadd.f32 %v2675_v12, %v696_v40 }
 0x118   : > { %v699_v44 = vpop.f32.mrb[15].mxu0  ;;  %v708_v62 = vadd.f32 %v2162_v41, %v2675_v12  ;;  %v2767_v63 = vmax.f32 %v705_v61, 0.0 }
 0x119   : > { %v700_v4 = vadd.f32 %v2675_v12, %v699_v44  ;;  %v2781_v11 = vmax.f32 %v697_v1, 0.0 }
 0x11a   : > { %777 = vrot.lane.b32.xlu1 %v2723_v43, %s2487_s14  ;;  %775 = vrot.lane.b32.xlu0 %v2721_v42, %s2487_s14  ;;  %v2769_v0 = vmax.f32 %v708_v62, 0.0 }
 0x11b   : > { %v2783_v13 = vmax.f32 %v700_v4, 0.0 }
 0x11d   : > { %v2165_v47 = vpop.f32.mrb[16].mxu0 }
 0x11e   : > { %891 = vrot.lane.b32.xlu1 %v2723_v43, %s2486_s3  ;;  %889 = vrot.lane.b32.xlu0 %v2721_v42, %s2486_s3  ;;  %v721_v48 = vadd.f32 %v2165_v47, %v2675_v12  ;;  %v712_v49 = vpop.f32.mrb[17].mxu0 }
 0x11f   : > { %v713_v50 = vadd.f32 %v2675_v12, %v712_v49  ;;  %v2166_v51 = vpop.f32.mrb[18].mxu0 }
 0x120   : > { %v724_v54 = vadd.f32 %v2166_v51, %v2675_v12  ;;  %v715_v55 = vpop.f32.mrb[19].mxu0 }
 0x121   : > { %v716_v56 = vadd.f32 %v2675_v12, %v715_v55  ;;  %v2793_v12 = vmax.f32 %v721_v48, 0.0  ;;  %v2801_v15 = vmax.f32 %v713_v50, 0.0 }
 0x122   : > { %789 = vrot.lane.b32.xlu1 %v2739_v53, %s2487_s14  ;;  %787 = vrot.lane.b32.xlu0 %v2737_v52, %s2487_s14  ;;  %v2795_v14 = vmax.f32 %v724_v54, 0.0 }
 0x123   : > { %v2803_v16 = vmax.f32 %v716_v56, 0.0 }
 0x126   : > { %903 = vrot.lane.b32.xlu1 %v2739_v53, %s2486_s3  ;;  %901 = vrot.lane.b32.xlu0 %v2737_v52, %s2486_s3 }
 0x12a   : > { %785 = vrot.lane.b32.xlu1 %v2755_v60, %s2487_s14  ;;  %783 = vrot.lane.b32.xlu0 %v2753_v59, %s2487_s14 }
 0x12e   : > { %899 = vrot.lane.b32.xlu1 %v2755_v60, %s2486_s3  ;;  %897 = vrot.lane.b32.xlu0 %v2753_v59, %s2486_s3 }
 0x132   : > { %797 = vrot.lane.b32.xlu1 %v2769_v0, %s2487_s14  ;;  %795 = vrot.lane.b32.xlu0 %v2767_v63, %s2487_s14 }
 0x136   : > { %911 = vrot.lane.b32.xlu1 %v2769_v0, %s2486_s3  ;;  %909 = vrot.lane.b32.xlu0 %v2767_v63, %s2486_s3 }
 0x13a   : > { %793 = vrot.lane.b32.xlu1 %v2783_v13, %s2487_s14  ;;  %791 = vrot.lane.b32.xlu0 %v2781_v11, %s2487_s14 }
 0x13e   : > { %907 = vrot.lane.b32.xlu1 %v2783_v13, %s2486_s3  ;;  %905 = vrot.lane.b32.xlu0 %v2781_v11, %s2486_s3 }
 0x142   : > { %805 = vrot.lane.b32.xlu1 %v2795_v14, %s2487_s14  ;;  %803 = vrot.lane.b32.xlu0 %v2793_v12, %s2487_s14 }
 0x146   : > { %801 = vrot.lane.b32.xlu1 %v2803_v16, %s2487_s14  ;;  %799 = vrot.lane.b32.xlu0 %v2801_v15, %s2487_s14 }
 0x14a   : > { %915 = vrot.lane.b32.xlu1 %v2803_v16, %s2486_s3  ;;  %913 = vrot.lane.b32.xlu0 %v2801_v15, %s2486_s3 }
 0x14e   : > { %919 = vrot.lane.b32.xlu1 %v2795_v14, %s2486_s3  ;;  %917 = vrot.lane.b32.xlu0 %v2793_v12, %s2486_s3 }
 0x174   : > { %v886_v18 = vpop.permute.xlu0 %885  ;;  %v772_v19 = vpop.permute.xlu1 %771 }
 0x175   : > { %830 = vst.msk [vmem:[#allocation2 + $0x10] sm:$0xff] %vm827_vm1, %v772_v19 }
 0x176   : > { %872 = vst.msk [vmem:[#allocation2 + $0x10] sm:$0x1] %vm870_vm2, %v2488_v20 }
 0x178   : > { %v774_v23 = vpop.permute.xlu1 %773  ;;  %v768_v24 = vpop.permute.xlu0 %767 }
 0x179   : > { %831 = vst.msk [vmem:[#allocation2 + $0x18] sm:$0xff] %vm827_vm1, %v774_v23  ;;  %828 = vst.msk [vmem:[#allocation2] sm:$0xff] %vm827_vm1, %v768_v24 }
 0x17a   : > { %852 = vst.msk [vmem:[#allocation2 + $0x11] sm:$0xff] %vm848_vm3, %v2678_v17 }
 0x17b   : > { %853 = vst.msk [vmem:[#allocation2 + $0x19] sm:$0x7f] %vm850_vm4, %v2688_v22 }
 0x17c   : > { %871 = vst.msk [vmem:[#allocation2] sm:$0x1] %vm870_vm2, %v2488_v20  ;;  %v888_v25 = vpop.permute.xlu1 %887  ;;  %v882_v26 = vpop.permute.xlu0 %881 }
 0x17d   : > { %945 = vst.msk [vmem:[#allocation2 + $0xf] sm:$0xfe] %vm941_vm5, %v886_v18 }
 0x17e   : > { %965 = vst.msk [vmem:[#allocation2 + $0x1f] sm:$0x1] %vm963_vm6, %v2488_v20 }
 0x17f   : > { %946 = vst.msk [vmem:[#allocation2 + $0x17] sm:$0xff] %vm943_vm7, %v888_v25 }
 0x180   : > { %v884_v27 = vpop.permute.xlu1 %883  ;;  %v770_v29 = vpop.permute.xlu0 %769 }
 0x181   : > { %829 = vst.msk [vmem:[#allocation2 + $0x8] sm:$0xff] %vm827_vm1, %v770_v29 }
 0x182   : > { %849 = vst.msk [vmem:[#allocation2 + $0x1] sm:$0xff] %vm848_vm3, %v2686_v21 }
 0x183   : > { %851 = vst.msk [vmem:[#allocation2 + $0x9] sm:$0x7f] %vm850_vm4, %v2699_v28 }
 0x184   : > { %942 = vst.msk [vmem:[#allocation2 - $0x1] sm:$0xfe] %vm941_vm5, %v882_v26  ;;  %v782_v17 = vpop.permute.xlu1 %781  ;;  %v780_v22 = vpop.permute.xlu0 %779 }
 0x185   : > { %944 = vst.msk [vmem:[#allocation2 + $0x7] sm:$0xff] %vm943_vm7, %v884_v27 }
 0x186   : > { %964 = vst.msk [vmem:[#allocation2 + $0xf] sm:$0x1] %vm963_vm6, %v2488_v20 }
 0x187   : > { %835 = vst.msk [vmem:[#allocation2 + $0x38] sm:$0xff] %vm827_vm1, %v782_v17  ;;  %834 = vst.msk [vmem:[#allocation2 + $0x30] sm:$0xff] %vm827_vm1, %v780_v22 }
 0x188   : > { %857 = vst.msk [vmem:[#allocation2 + $0x39] sm:$0x7f] %vm850_vm4, %v2709_v35  ;;  %v896_v21 = vpop.permute.xlu1 %895  ;;  %v894_v28 = vpop.permute.xlu0 %893 }
 0x189   : > { %856 = vst.msk [vmem:[#allocation2 + $0x31] sm:$0xff] %vm848_vm3, %v2707_v34 }
 0x18a   : > { %874 = vst.msk [vmem:[#allocation2 + $0x30] sm:$0x1] %vm870_vm2, %v2488_v20 }
 0x18b   : > { %967 = vst.msk [vmem:[#allocation2 + $0x3f] sm:$0x1] %vm963_vm6, %v2488_v20 }
 0x18c   : > { %950 = vst.msk [vmem:[#allocation2 + $0x37] sm:$0xff] %vm943_vm7, %v896_v21  ;;  %v778_v30 = vpop.permute.xlu1 %777  ;;  %v776_v31 = vpop.permute.xlu0 %775 }
 0x18d   : > { %949 = vst.msk [vmem:[#allocation2 + $0x2f] sm:$0xfe] %vm941_vm5, %v894_v28 }
 0x18e   : > { %833 = vst.msk [vmem:[#allocation2 + $0x28] sm:$0xff] %vm827_vm1, %v778_v30  ;;  %832 = vst.msk [vmem:[#allocation2 + $0x20] sm:$0xff] %vm827_vm1, %v776_v31 }
 0x18f   : > { %855 = vst.msk [vmem:[#allocation2 + $0x29] sm:$0x7f] %vm850_vm4, %v2723_v43 }
 0x190   : > { %854 = vst.msk [vmem:[#allocation2 + $0x21] sm:$0xff] %vm848_vm3, %v2721_v42  ;;  %v892_v32 = vpop.permute.xlu1 %891  ;;  %v890_v33 = vpop.permute.xlu0 %889 }
 0x191   : > { %873 = vst.msk [vmem:[#allocation2 + $0x20] sm:$0x1] %vm870_vm2, %v2488_v20 }
 0x192   : > { %966 = vst.msk [vmem:[#allocation2 + $0x2f] sm:$0x1] %vm963_vm6, %v2488_v20 }
 0x193   : > { %948 = vst.msk [vmem:[#allocation2 + $0x27] sm:$0xff] %vm943_vm7, %v892_v32 }
 0x194   : > { %947 = vst.msk [vmem:[#allocation2 + $0x1f] sm:$0xfe] %vm941_vm5, %v890_v33  ;;  %v790_v34 = vpop.permute.xlu1 %789  ;;  %v788_v35 = vpop.permute.xlu0 %787 }
 0x195   : > { %839 = vst.msk [vmem:[#allocation2 + $0x58] sm:$0xff] %vm827_vm1, %v790_v34  ;;  %838 = vst.msk [vmem:[#allocation2 + $0x50] sm:$0xff] %vm827_vm1, %v788_v35 }
 0x196   : > { %861 = vst.msk [vmem:[#allocation2 + $0x59] sm:$0x7f] %vm850_vm4, %v2739_v53 }
 0x197   : > { %860 = vst.msk [vmem:[#allocation2 + $0x51] sm:$0xff] %vm848_vm3, %v2737_v52 }
 0x198   : > { %876 = vst.msk [vmem:[#allocation2 + $0x50] sm:$0x1] %vm870_vm2, %v2488_v20  ;;  %v904_v36 = vpop.permute.xlu1 %903  ;;  %v902_v37 = vpop.permute.xlu0 %901 }
 0x199   : > { %969 = vst.msk [vmem:[#allocation2 + $0x5f] sm:$0x1] %vm963_vm6, %v2488_v20 }
 0x19a   : > { %954 = vst.msk [vmem:[#allocation2 + $0x57] sm:$0xff] %vm943_vm7, %v904_v36 }
 0x19b   : > { %953 = vst.msk [vmem:[#allocation2 + $0x4f] sm:$0xfe] %vm941_vm5, %v902_v37 }
 0x19c   : > { %v786_v38 = vpop.permute.xlu1 %785  ;;  %v784_v39 = vpop.permute.xlu0 %783  ;;  %979 = vst.msk [vmem:[#allocation2] sm:$0xff] (!%p1998_p4), %vm978_vm8, %v2489_v58  ;;  %980 = vst.msk [vmem:[#allocation2 + $0x8] sm:$0xff] (!%p1998_p4), %vm978_vm8, %v2489_v58 }
 0x19d   : > { %837 = vst.msk [vmem:[#allocation2 + $0x48] sm:$0xff] %vm827_vm1, %v786_v38  ;;  %836 = vst.msk [vmem:[#allocation2 + $0x40] sm:$0xff] %vm827_vm1, %v784_v39 }
 0x19e   : > { %859 = vst.msk [vmem:[#allocation2 + $0x49] sm:$0x7f] %vm850_vm4, %v2755_v60 }
 0x19f   : > { %858 = vst.msk [vmem:[#allocation2 + $0x41] sm:$0xff] %vm848_vm3, %v2753_v59 }
 0x1a0   : > { %875 = vst.msk [vmem:[#allocation2 + $0x40] sm:$0x1] %vm870_vm2, %v2488_v20  ;;  %v900_v40 = vpop.permute.xlu1 %899  ;;  %v898_v41 = vpop.permute.xlu0 %897 }
 0x1a1   : > { %968 = vst.msk [vmem:[#allocation2 + $0x4f] sm:$0x1] %vm963_vm6, %v2488_v20 }
 0x1a2   : > { %952 = vst.msk [vmem:[#allocation2 + $0x47] sm:$0xff] %vm943_vm7, %v900_v40 }
 0x1a3   : > { %951 = vst.msk [vmem:[#allocation2 + $0x3f] sm:$0xfe] %vm941_vm5, %v898_v41 }
 0x1a4   : > { %v798_v42 = vpop.permute.xlu1 %797  ;;  %v796_v43 = vpop.permute.xlu0 %795 }
 0x1a5   : > { %843 = vst.msk [vmem:[#allocation2 + $0x78] sm:$0xff] %vm827_vm1, %v798_v42  ;;  %842 = vst.msk [vmem:[#allocation2 + $0x70] sm:$0xff] %vm827_vm1, %v796_v43 }
 0x1a6   : > { %865 = vst.msk [vmem:[#allocation2 + $0x79] sm:$0x7f] %vm850_vm4, %v2769_v0 }
 0x1a7   : > { %864 = vst.msk [vmem:[#allocation2 + $0x71] sm:$0xff] %vm848_vm3, %v2767_v63 }
 0x1a8   : > { %878 = vst.msk [vmem:[#allocation2 + $0x70] sm:$0x1] %vm870_vm2, %v2488_v20  ;;  %v912_v44 = vpop.permute.xlu1 %911  ;;  %v910_v45 = vpop.permute.xlu0 %909 }
 0x1a9   : > { %971 = vst.msk [vmem:[#allocation2 + $0x7f] sm:$0x1] %vm963_vm6, %v2488_v20 }
 0x1aa   : > { %958 = vst.msk [vmem:[#allocation2 + $0x77] sm:$0xff] %vm943_vm7, %v912_v44 }
 0x1ab   : > { %957 = vst.msk [vmem:[#allocation2 + $0x6f] sm:$0xfe] %vm941_vm5, %v910_v45 }
 0x1ac   : > { %v794_v46 = vpop.permute.xlu1 %793  ;;  %v792_v47 = vpop.permute.xlu0 %791 }
 0x1ad   : > { %841 = vst.msk [vmem:[#allocation2 + $0x68] sm:$0xff] %vm827_vm1, %v794_v46  ;;  %840 = vst.msk [vmem:[#allocation2 + $0x60] sm:$0xff] %vm827_vm1, %v792_v47 }
 0x1ae   : > { %863 = vst.msk [vmem:[#allocation2 + $0x69] sm:$0x7f] %vm850_vm4, %v2783_v13 }
 0x1af   : > { %862 = vst.msk [vmem:[#allocation2 + $0x61] sm:$0xff] %vm848_vm3, %v2781_v11 }
 0x1b0   : > { %877 = vst.msk [vmem:[#allocation2 + $0x60] sm:$0x1] %vm870_vm2, %v2488_v20  ;;  %v908_v48 = vpop.permute.xlu1 %907  ;;  %v906_v49 = vpop.permute.xlu0 %905 }
 0x1b1   : > { %970 = vst.msk [vmem:[#allocation2 + $0x6f] sm:$0x1] %vm963_vm6, %v2488_v20 }
 0x1b2   : > { %956 = vst.msk [vmem:[#allocation2 + $0x67] sm:$0xff] %vm943_vm7, %v908_v48 }
 0x1b3   : > { %955 = vst.msk [vmem:[#allocation2 + $0x5f] sm:$0xfe] %vm941_vm5, %v906_v49 }
 0x1b4   : > { %v806_v50 = vpop.permute.xlu1 %805  ;;  %v804_v51 = vpop.permute.xlu0 %803 }
 0x1b5   : > { %847 = vst.msk [vmem:[#allocation2 + $0x98] sm:$0xff] %vm827_vm1, %v806_v50  ;;  %846 = vst.msk [vmem:[#allocation2 + $0x90] sm:$0xff] %vm827_vm1, %v804_v51 }
 0x1b6   : > { %869 = vst.msk [vmem:[#allocation2 + $0x99] sm:$0x7f] %vm850_vm4, %v2795_v14 }
 0x1b7   : > { %868 = vst.msk [vmem:[#allocation2 + $0x91] sm:$0xff] %vm848_vm3, %v2793_v12 }
 0x1b8   : > { %880 = vst.msk [vmem:[#allocation2 + $0x90] sm:$0x1] %vm870_vm2, %v2488_v20  ;;  %v802_v52 = vpop.permute.xlu1 %801  ;;  %v800_v53 = vpop.permute.xlu0 %799 }
 0x1b9   : > { %973 = vst.msk [vmem:[#allocation2 + $0x9f] sm:$0x1] %vm963_vm6, %v2488_v20 }
 0x1ba   : > { %845 = vst.msk [vmem:[#allocation2 + $0x88] sm:$0xff] %vm827_vm1, %v802_v52  ;;  %844 = vst.msk [vmem:[#allocation2 + $0x80] sm:$0xff] %vm827_vm1, %v800_v53 }
 0x1bb   : > { %867 = vst.msk [vmem:[#allocation2 + $0x89] sm:$0x7f] %vm850_vm4, %v2803_v16 }
 0x1bc   : > { %866 = vst.msk [vmem:[#allocation2 + $0x81] sm:$0xff] %vm848_vm3, %v2801_v15  ;;  %v916_v54 = vpop.permute.xlu1 %915  ;;  %v914_v55 = vpop.permute.xlu0 %913  ;;  %977 = sbr.rel (%p1998_p4) target bundleno = 451 (0x1c3), region = 60 }
 0x1bd   : > { %879 = vst.msk [vmem:[#allocation2 + $0x80] sm:$0x1] %vm870_vm2, %v2488_v20 }
 0x1be   : > { %972 = vst.msk [vmem:[#allocation2 + $0x8f] sm:$0x1] %vm963_vm6, %v2488_v20 }
 0x1bf   : > { %960 = vst.msk [vmem:[#allocation2 + $0x87] sm:$0xff] %vm943_vm7, %v916_v54 }
 0x1c0   : > { %959 = vst.msk [vmem:[#allocation2 + $0x7f] sm:$0xfe] %vm941_vm5, %v914_v55  ;;  %v920_v56 = vpop.permute.xlu1 %919  ;;  %v918_v57 = vpop.permute.xlu0 %917 }
 0x1c1   : > { %962 = vst.msk [vmem:[#allocation2 + $0x97] sm:$0xff] %vm943_vm7, %v920_v56 }
 0x1c2   : > { %961 = vst.msk [vmem:[#allocation2 + $0x8f] sm:$0xfe] %vm941_vm5, %v918_v57 }
 0x1c3 PF: > { %p1999_p5 = scmp.ne.s32.totalorder %s2468_s12, 1 }
 0x1c4   : > { %vm986_vm9 = vcmask (!%p1999_p5), 195584   ;;  %v2490_v59 = vmov (!%p1999_p5), 0.0  }
 0x1c5   : > { %984 = sbr.rel (%p1999_p5) target bundleno = 460 (0x1cc), region = 64  ;;  %987 = vst.msk [vmem:[#allocation2 + $0x90] sm:$0xff] (!%p1999_p5), %vm986_vm9, %v2490_v59  ;;  %988 = vst.msk [vmem:[#allocation2 + $0x98] sm:$0xff] (!%p1999_p5), %vm986_vm9, %v2490_v59 }
 0x1cc PF: > { %v2384_v60 = vld [vmem:[%s3145_s5 + $0xc] sm:$0xff]   ;;  %v2385_v61 = vld [vmem:[%s3145_s5 + $0x14] ss:$0 sps:$4 sm:$0xff]   ;;  %vm1079_vm10 = vcmask 1043456   ;;  %v1022_v63 = vld [vmem:[#allocation2 + $0x38] sm:$0xff]  ;;  %vm1054_vm11 = vcmask 195584  }
 0x1cd   : > { %v1021_v62 = vld [vmem:[#allocation2 + $0x30] sm:$0xff]  ;;  %2245 = vmatprep.subr.bf16.mxu1 %v2384_v60  ;;  %v1023_v0 = vld [vmem:[#allocation2 + $0x40] sm:$0xff]  ;;  %2167 = vmatprep.subr.bf16.mxu0 %v2384_v60  ;;  %v1024_v4 = vld [vmem:[#allocation2 + $0x48] sm:$0xff]  ;;  %v1081_v11 = vsel %vm1079_vm10, %v2385_v61, 0  ;;  %vm1782_vm12 = vcmask 257024   ;;  %s2063_s18 = sshll.u32 %s2468_s12, 4 }
 0x1ce   : > { %2247 = vmatpush3.bf16.msra.mxu1 %v2384_v60  ;;  %v1035_v1 = vpack.c.bf16 %v1022_v63, %v1021_v62  ;;  %2168 = vmatpush3.bf16.msra.mxu0 %v2384_v60  ;;  %v2386_v13 = vld [vmem:[%s3145_s5] sm:$0xff]   ;;  %v1025_v12 = vld [vmem:[#allocation2 + $0x50] sm:$0xff]  ;;  %v1026_v14 = vld [vmem:[#allocation2 + $0x58] sm:$0xff]  ;;  %v1036_v15 = vpack.c.bf16 %v1024_v4, %v1023_v0  ;;  %s2064_s26 = sshll.u32 %s2472_s13, 5  ;;  %s1815_s29 = sshll.u32 %s2938_s23, 4  ;;  %s3078_s29 = int_to_ptr.vmem [resolvable:$true] %s1815_s29 }
 0x1cf   : > { %2282 = vmatprep.subr.msk.bf16.mxu1 %vm1079_vm10, %v2385_v61  ;;  %2281 = vmatprep.subr.msk.bf16.mxu0 %vm1079_vm10, %v2385_v61  ;;  %v1037_v16 = vpack.c.bf16 %v1026_v14, %v1025_v12  ;;  %v2387_v18 = vld [vmem:[%s3145_s5 + $0x8] ss:$0 sps:$4 sm:$0xff]   ;;  %v991_v19 = vld [vmem:[#allocation2 + $0x10] sm:$0xff]  ;;  %v992_v20 = vld [vmem:[#allocation2 + $0x18] sm:$0xff]  ;;  %s1812_s12 = sadd.s32 %s2064_s26, %s2063_s18  ;;  %s3170_s28 = sand.u32 1, %s2460_s10  }
 0x1d0   : > { %2175 = vmatprep.mubr.msk.bf16.mxu1 %vm1054_vm11, %v1035_v1  ;;  %v993_v23 = vld [vmem:[#allocation2 + $0x20] sm:$0xff]  ;;  %v1006_v24 = vpack.c.bf16 %v992_v20, %v991_v19  ;;  %v994_v25 = vld [vmem:[#allocation2 + $0x28] sm:$0xff]  ;;  %v1214_v17 = vsel %vm1079_vm10, %v2387_v18, 0  ;;  %v1029_v22 = vld [vmem:[#allocation2 + $0x70] sm:$0xff]  ;;  %s2065_s13 = sshll.u32 %s1812_s12, 6  ;;  %s3088_s15 = scalar_lea.sflag [#allocation4], %s3170_s28 }
 0x1d1   : > { %v1027_v26 = vld [vmem:[#allocation2 + $0x60] sm:$0xff]  ;;  %v1028_v27 = vld [vmem:[#allocation2 + $0x68] sm:$0xff]  ;;  %v1007_v29 = vpack.c.bf16 %v994_v25, %v993_v23  ;;  %v1030_v21 = vld [vmem:[#allocation2 + $0x78] sm:$0xff]  ;;  %s3076_s17 = scalar_lea.hbm %s3149_s9, %s2065_s13  ;;  %s2390_s20 = scalar_lea.vmem %s3078_s29, 1024 }
 0x1d2   : > { %2248 = vmatpush3.bf16.msra.mxu1 %v1081_v11  ;;  %2170 = vmatpush3.bf16.msra.mxu0 %v1081_v11  ;;  %v2388_v28 = vld [vmem:[%s3145_s5 + $0x18] sm:$0xff]   ;;  %v1038_v30 = vpack.c.bf16 %v1028_v27, %v1027_v26  ;;  %v1039_v31 = vpack.c.bf16 %v1030_v21, %v1029_v22  ;;  %v1031_v32 = vld [vmem:[#allocation2 + $0x80] sm:$0xff]  ;;  %v1032_v33 = vld [vmem:[#allocation2 + $0x88] sm:$0xff]  ;;  %p2391_p6 = scmp.ne.s32.totalorder %s3078_s29, %s2390_s20  ;;  %s2491_s21 = smov [#allocation3]  }
 0x1d3   : > { %2187 = vmatprep.subr.bf16.mxu1 %v2386_v13  ;;  %2171 = vmatprep.mubr.msk.bf16.mxu0 %vm1054_vm11, %v1006_v24  ;;  %v989_v34 = vld [vmem:[#allocation2] sm:$0xff]  ;;  %v990_v35 = vld [vmem:[#allocation2 + $0x8] sm:$0xff]  ;;  %v1040_v36 = vpack.c.bf16 %v1032_v33, %v1031_v32  ;;  %v1328_v40 = vld [vmem:[#allocation2 + $0x90] sm:$0xff]  ;;  %s2394_s30 = sshll.u32 %s2491_s21, 4  ;;  %s2395_s30 = int_to_ptr.vmem [resolvable:$false] %s2394_s30 }
 0x1d4   : > { %v1005_v37 = vpack.c.bf16 %v990_v35, %v989_v34  ;;  %v2389_v38 = vld [vmem:[%s3145_s5 + $0x20] ss:$0 sps:$4 sm:$0xff]   ;;  %v1329_v41 = vld [vmem:[#allocation2 + $0x98] sm:$0xff]  ;;  %p2392_p7 = pnand %p2391_p6, %p2595_p3  ;;  %s2396_s11 = scalar_lea.vmem %s2395_s30, 2048 }
 0x1d5   : > { %2176 = vmatmul.mubr.msk.bf16.vlgmr.msra.gmra.mrb[0].mxu1 %vm1054_vm11, %v1036_v15  ;;  %2172 = vmatmul.mubr.msk.bf16.vlgmr.msra.gmra.mrb[20].mxu0 %vm1054_vm11, %v1007_v29  ;;  %v1376_v39 = vsel %vm1079_vm10, %v2389_v38, 0  ;;  %v1337_v42 = vpack.c.bf16 %v1329_v41, %v1328_v40  ;;  %v1538_v43 = vld [vmem:[%s3147_s7] sm:$0xf]  ;;  %p2397_p10 = scmp.lt.s32.totalorder %s3078_s29, %s2395_s30  ;;  %p2398_p11 = scmp.lt.s32.totalorder %s2396_s11, %s2390_s20 }
 0x1d6   : > { %2188 = vmatpush3.bf16.msra.mxu1 %v2386_v13  ;;  %2179 = vmatprep.mubr.msk.bf16.mxu1 %vm1054_vm11, %v1037_v16  ;;  %v1571_v44 = vsel %vm1079_vm10, %v1538_v43, 0  ;;  %v2036_v50 = vld [vmem:[%s3146_s6] ss:$0 sm:$0xff]  ;;  %p2393_p9 = pneg %p2392_p7 }
 0x1d7   : > { %2283 = vmatprep.subr.msk.bf16.mxu1 %vm1079_vm10, %v2387_v18  ;;  %2285 = vmatprep.subr.msk.bf16.mxu0 %vm1079_vm10, %v1538_v43  ;;  %p2399_p12 = por %p2398_p11, %p2397_p10 }
 0x1d8   : > { %2228 = vmatpush3.bf16.msra.mxu0 %v1571_v44 }
 0x1d9   : > { %p2400_p13 = pnand %p2399_p12, %p2393_p9 }
 0x1da   : > { %2190 = vmatpush3.bf16.msra.mxu1 %v1214_v17 }
 0x1db   : > { %2207 = vmatprep.subr.bf16.mxu1 %v2388_v28 }
 0x1dd   : > { %2180 = vmatmul.mubr.msk.bf16.gmra.mrb[4].mxu1 %vm1054_vm11, %v1038_v30 }
 0x1de   : > { %2183 = vmatprep.mubr.msk.bf16.mxu1 %vm1054_vm11, %v1039_v31 }
 0x1e5   : > { %2184 = vmatmul.mubr.msk.bf16.gmra.mrb[8].mxu1 %vm1054_vm11, %v1040_v36 }
 0x1e6   : > { %2191 = vmatprep.mubr.msk.bf16.mxu1 %vm1054_vm11, %v1005_v37 }
 0x1ed   : > { %2192 = vmatmul.mubr.msk.bf16.vlgmr.msra.gmra.mrb[12].mxu1 %vm1054_vm11, %v1006_v24 }
 0x1ee   : > { %2208 = vmatpush3.bf16.msra.mxu1 %v2388_v28  ;;  %2195 = vmatprep.mubr.msk.bf16.mxu1 %vm1054_vm11, %v1007_v29 }
 0x1ef   : > { %2284 = vmatprep.subr.msk.bf16.mxu1 %vm1079_vm10, %v2389_v38 }
 0x1f2   : > { %2210 = vmatpush3.bf16.msra.mxu1 %v1376_v39 }
 0x1f5   : > { %2196 = vmatmul.mubr.msk.bf16.gmra.mrb[0].mxu1 %vm1054_vm11, %v1035_v1 }
 0x1f6   : > { %2199 = vmatprep.mubr.msk.bf16.mxu1 %vm1054_vm11, %v1036_v15 }
 0x1fd   : > { %2200 = vmatmul.mubr.msk.bf16.gmra.mrb[4].mxu1 %vm1054_vm11, %v1037_v16 }
 0x1fe   : > { %2203 = vmatprep.mubr.msk.bf16.mxu1 %vm1054_vm11, %v1038_v30 }
 0x205   : > { %2204 = vmatmul.mubr.msk.bf16.gmra.mrb[8].mxu1 %vm1054_vm11, %v1039_v31 }
 0x206   : > { %2211 = vmatprep.mubr.msk.bf16.mxu1 %vm1054_vm11, %v1007_v29 }
 0x20d   : > { %2212 = vmatmul.mubr.msk.bf16.vlgmr.msra.gmra.mrb[12].mxu1 %vm1054_vm11, %v1035_v1 }
 0x20e   : > { %2215 = vmatprep.mubr.msk.bf16.mxu1 %vm1054_vm11, %v1036_v15 }
 0x215   : > { %2216 = vmatmul.mubr.msk.bf16.gmra.mrb[0].mxu1 %vm1054_vm11, %v1037_v16 }
 0x216   : > { %2219 = vmatprep.mubr.msk.bf16.mxu1 %vm1054_vm11, %v1038_v30 }
 0x21d   : > { %2220 = vmatmul.mubr.msk.bf16.gmra.mrb[4].mxu1 %vm1054_vm11, %v1039_v31 }
 0x21e   : > { %2223 = vmatprep.mubr.msk.bf16.mxu1 %vm1054_vm11, %v1040_v36 }
 0x225   : > { %2224 = vmatmul.mubr.msk.bf16.gmra.mrb[8].mxu1 %vm1054_vm11, %v1337_v42 }
 0x2a8   : > { %v2173_v45 = vpop.f32.mrb[20].mxu0 }
 0x2a9   : > { %v1117_v46 = vpop.f32.mrb[21].mxu0 }
 0x2aa   : > { %v2174_v47 = vpop.f32.mrb[22].mxu0 }
 0x2ab   : > { %v1120_v48 = vpop.f32.mrb[23].mxu0 }
 0x2e0   : > { %v2213_v49 = vpop.f32.mrb[12].mxu1 }
 0x2e1   : > { %v2249_v51 = vadd.f32 %v2213_v49, %v2173_v45  ;;  %v1412_v52 = vpop.f32.mrb[13].mxu1 }
 0x2e2   : > { %v2250_v53 = vadd.f32 %v1412_v52, %v1117_v46  ;;  %v2214_v54 = vpop.f32.mrb[14].mxu1 }
 0x2e3   : > { %v1500_v55 = vadd.f32 %v2249_v51, %v2036_v50  ;;  %v2251_v56 = vadd.f32 %v2214_v54, %v2174_v47  ;;  %v1415_v57 = vpop.f32.mrb[15].mxu1 }
 0x2e4   : > { %v1498_v58 = vadd.f32 %v2250_v53, %v2036_v50  ;;  %v2252_v59 = vadd.f32 %v1415_v57, %v1120_v48  ;;  %v1670_v57 = vunpack.c.l.bf16 %v2632_v2 }
 0x2e5   : > { %v1501_v60 = vadd.f32 %v2251_v56, %v2036_v50  ;;  %v1516_v62 = vmax.f32 %v1500_v55, 0.0  ;;  %v3010_v55 = vld [vmem:[%s3148_s8] ss:$0 sm:$0xff]  ;;  %v1672_v56 = vunpack.c.l.bf16 %v2634_v3 }
 0x2e6   : > { %v1499_v61 = vadd.f32 %v2252_v59, %v2036_v50  ;;  %v1514_v0 = vmax.f32 %v1498_v58, 0.0 }
 0x2e7   : > { %v1517_v63 = vmax.f32 %v1501_v60, 0.0  ;;  %v1673_v60 = vunpack.c.h.bf16 %v2634_v3 }
 0x2e8   : > { %v1515_v1 = vmax.f32 %v1499_v61, 0.0  ;;  %v2217_v4 = vpop.f32.mrb[0].mxu1 }
 0x2e9   : > { %v1531_v11 = vpack.c.bf16 %v1517_v63, %v1516_v62  ;;  %v1504_v13 = vadd.f32 %v2217_v4, %v2036_v50  ;;  %v1428_v12 = vpop.f32.mrb[1].mxu1  ;;  %v1671_v63 = vunpack.c.h.bf16 %v2632_v2 }
 0x2ea   : > { %v1502_v14 = vadd.f32 %v2036_v50, %v1428_v12  ;;  %v2218_v15 = vpop.f32.mrb[2].mxu1  ;;  %v1530_v16 = vpack.c.bf16 %v1515_v1, %v1514_v0 }
 0x2eb   : > { %v1505_v18 = vadd.f32 %v2218_v15, %v2036_v50  ;;  %v1431_v19 = vpop.f32.mrb[3].mxu1  ;;  %v1520_v23 = vmax.f32 %v1504_v13, 0.0 }
 0x2ec   : > { %v1503_v20 = vadd.f32 %v2036_v50, %v1431_v19  ;;  %2229 = vmatprep.mubr.msk.bf16.mxu0 %vm848_vm3, %v1530_v16  ;;  %v1518_v25 = vmax.f32 %v1502_v14, 0.0  ;;  %v1676_v19 = vunpack.c.l.bf16 %v2649_v6 }
 0x2ed   : > { %v1521_v24 = vmax.f32 %v1505_v18, 0.0  ;;  %2230 = vmatmul.mubr.msk.bf16.vlgmr.msra.gmra.mrb[24].mxu0 %vm848_vm3, %v1531_v11 }
 0x2ee   : > { %v1519_v26 = vmax.f32 %v1503_v20, 0.0 }
 0x2ef   : > { %v1533_v27 = vpack.c.bf16 %v1521_v24, %v1520_v23  ;;  %v1674_v24 = vunpack.c.l.bf16 %v2647_v5 }
 0x2f0   : > { %v1532_v29 = vpack.c.bf16 %v1519_v26, %v1518_v25  ;;  %v2221_v17 = vpop.f32.mrb[4].mxu1 }
 0x2f1   : > { %v1508_v22 = vadd.f32 %v2221_v17, %v2036_v50  ;;  %v1444_v21 = vpop.f32.mrb[5].mxu1 }
 0x2f2   : > { %v1506_v28 = vadd.f32 %v2036_v50, %v1444_v21  ;;  %v2222_v30 = vpop.f32.mrb[6].mxu1  ;;  %2233 = vmatprep.mubr.msk.bf16.mxu0 %vm848_vm3, %v1532_v29  ;;  %v1677_v29 = vunpack.c.h.bf16 %v2649_v6 }
 0x2f3   : > { %v1509_v31 = vadd.f32 %v2222_v30, %v2036_v50  ;;  %v1447_v32 = vpop.f32.mrb[7].mxu1  ;;  %v1524_v34 = vmax.f32 %v1508_v22, 0.0 }
 0x2f4   : > { %v1507_v33 = vadd.f32 %v2036_v50, %v1447_v32  ;;  %v1522_v36 = vmax.f32 %v1506_v28, 0.0  ;;  %v1675_v28 = vunpack.c.h.bf16 %v2647_v5  ;;  %v1680_v5 = vunpack.c.l.bf16 %v2657_v8 }
 0x2f5   : > { %v1525_v35 = vmax.f32 %v1509_v31, 0.0  ;;  %2234 = vmatmul.mubr.msk.bf16.gmra.mrb[28].mxu0 %vm848_vm3, %v1533_v27 }
 0x2f6   : > { %v1523_v37 = vmax.f32 %v1507_v33, 0.0 }
 0x2f7   : > { %v1535_v38 = vpack.c.bf16 %v1525_v35, %v1524_v34 }
 0x2f8   : > { %v1534_v39 = vpack.c.bf16 %v1523_v37, %v1522_v36  ;;  %v2225_v40 = vpop.f32.mrb[8].mxu1 }
 0x2f9   : > { %v1512_v41 = vadd.f32 %v2225_v40, %v2036_v50  ;;  %v1460_v42 = vpop.f32.mrb[9].mxu1 }
 0x2fa   : > { %v1510_v43 = vadd.f32 %v2036_v50, %v1460_v42  ;;  %v2226_v44 = vpop.f32.mrb[10].mxu1  ;;  %2237 = vmatprep.mubr.msk.bf16.mxu0 %vm848_vm3, %v1534_v39 }
 0x2fb   : > { %v1513_v45 = vadd.f32 %v2226_v44, %v2036_v50  ;;  %v1463_v46 = vpop.f32.mrb[11].mxu1  ;;  %v1528_v48 = vmax.f32 %v1512_v41, 0.0 }
 0x2fc   : > { %v1511_v47 = vadd.f32 %v2036_v50, %v1463_v46  ;;  %v1526_v51 = vmax.f32 %v1510_v43, 0.0  ;;  %v1678_v43 = vunpack.c.l.bf16 %v2655_v7 }
 0x2fd   : > { %v1529_v49 = vmax.f32 %v1513_v45, 0.0  ;;  %2238 = vmatmul.mubr.msk.bf16.gmra.mrb[32].mxu0 %vm848_vm3, %v1535_v38 }
 0x2fe   : > { %v1527_v52 = vmax.f32 %v1511_v47, 0.0  ;;  %v1681_v47 = vunpack.c.h.bf16 %v2657_v8 }
 0x2ff   : > { %v1537_v53 = vpack.c.bf16 %v1529_v49, %v1528_v48 }
 0x300   : > { %v1536_v54 = vpack.c.bf16 %v1527_v52, %v1526_v51  ;;  %v1679_v52 = vunpack.c.h.bf16 %v2655_v7 }
 0x302   : > { %2241 = vmatprep.mubr.msk.bf16.mxu0 %vm848_vm3, %v1536_v54 }
 0x305   : > { %2242 = vmatmul.mubr.msk.bf16.gmra.mrb[36].mxu0 %vm848_vm3, %v1537_v53 }
 0x3c0   : > { %v2231_v50 = vpop.f32.mrb[24].mxu0 }
 0x3c1   : > { %v1616_v58 = vadd.f32 %v2231_v50, %v3010_v55  ;;  %v1607_v59 = vpop.f32.mrb[25].mxu0 }
 0x3c2   : > { %v1608_v61 = vadd.f32 %v3010_v55, %v1607_v59  ;;  %v2232_v62 = vpop.f32.mrb[26].mxu0 }
 0x3c3   : > { %v1688_v0 = vadd.f32 %v1672_v56, %v1616_v58  ;;  %v1619_v1 = vadd.f32 %v2232_v62, %v3010_v55  ;;  %v1610_v4 = vpop.f32.mrb[27].mxu0  ;;  %v1684_v62 = vunpack.c.l.bf16 %v2665_v10 }
 0x3c4   : > { %v1686_v11 = vadd.f32 %v1670_v57, %v1608_v61  ;;  %v1611_v13 = vadd.f32 %v3010_v55, %v1610_v4  ;;  %v1682_v4 = vunpack.c.l.bf16 %v2663_v9 }
 0x3c5   : > { %v1704_v12 = vmax.f32 %v1688_v0, 0.0  ;;  %v1689_v14 = vadd.f32 %v1673_v60, %v1619_v1 }
 0x3c6   : > { %v1702_v15 = vmax.f32 %v1686_v11, 0.0  ;;  %v1687_v16 = vadd.f32 %v1671_v63, %v1611_v13 }
 0x3c7   : > { %v2078_v3 = vpack.c.bf16 %v1704_v12, %v1704_v12  ;;  %v1705_v18 = vmax.f32 %v1689_v14, 0.0  ;;  %v1685_v14 = vunpack.c.h.bf16 %v2665_v10 }
 0x3c8   : > { %v2076_v2 = vpack.c.bf16 %v1702_v15, %v1702_v15  ;;  %v1703_v20 = vmax.f32 %v1687_v16, 0.0  ;;  %v2235_v23 = vpop.f32.mrb[28].mxu0 }
 0x3c9   : > { %1785 = vst.msk [vmem:[%s2938_s23 + $0x8] sm:$0xf] %vm1782_vm12, %v2078_v3  ;;  %v2079_v25 = vpack.c.bf16 %v1705_v18, %v1705_v18  ;;  %v1632_v26 = vadd.f32 %v2235_v23, %v3010_v55  ;;  %v1623_v27 = vpop.f32.mrb[29].mxu0  ;;  %v1683_v18 = vunpack.c.h.bf16 %v2663_v9 }
 0x3ca   : > { %1783 = vst.msk [vmem:[%s2938_s23] sm:$0xf] %vm1782_vm12, %v2076_v2  ;;  %v2077_v17 = vpack.c.bf16 %v1703_v20, %v1703_v20  ;;  %v1624_v22 = vadd.f32 %v3010_v55, %v1623_v27  ;;  %v2236_v21 = vpop.f32.mrb[30].mxu0 }
 0x3cb   : > { %1786 = vst.msk [vmem:[%s2938_s23 + $0xc] sm:$0xf] %vm1782_vm12, %v2079_v25  ;;  %v1692_v30 = vadd.f32 %v1676_v19, %v1632_v26  ;;  %v1635_v31 = vadd.f32 %v2236_v21, %v3010_v55  ;;  %v1626_v32 = vpop.f32.mrb[31].mxu0 }
 0x3cc   : > { %1784 = vst.msk [vmem:[%s2938_s23 + $0x4] sm:$0xf] %vm1782_vm12, %v2077_v17  ;;  %v1690_v33 = vadd.f32 %v1674_v24, %v1624_v22  ;;  %v1627_v6 = vadd.f32 %v3010_v55, %v1626_v32 }
 0x3cd   : > { %v1708_v34 = vmax.f32 %v1692_v30, 0.0  ;;  %v1693_v35 = vadd.f32 %v1677_v29, %v1635_v31 }
 0x3ce   : > { %v1706_v36 = vmax.f32 %v1690_v33, 0.0  ;;  %v1691_v37 = vadd.f32 %v1675_v28, %v1627_v6 }
 0x3cf   : > { %v2082_v38 = vpack.c.bf16 %v1708_v34, %v1708_v34  ;;  %v1709_v39 = vmax.f32 %v1693_v35, 0.0 }
 0x3d0   : > { %v2080_v40 = vpack.c.bf16 %v1706_v36, %v1706_v36  ;;  %v1707_v41 = vmax.f32 %v1691_v37, 0.0  ;;  %v2239_v42 = vpop.f32.mrb[32].mxu0 }
 0x3d1   : > { %1789 = vst.msk [vmem:[%s2938_s23 + $0x18] sm:$0xf] %vm1782_vm12, %v2082_v38  ;;  %v2083_v44 = vpack.c.bf16 %v1709_v39, %v1709_v39  ;;  %v1648_v45 = vadd.f32 %v2239_v42, %v3010_v55  ;;  %v1639_v46 = vpop.f32.mrb[33].mxu0 }
 0x3d2   : > { %1787 = vst.msk [vmem:[%s2938_s23 + $0x10] sm:$0xf] %vm1782_vm12, %v2080_v40  ;;  %v2081_v48 = vpack.c.bf16 %v1707_v41, %v1707_v41  ;;  %v1640_v49 = vadd.f32 %v3010_v55, %v1639_v46  ;;  %v2240_v51 = vpop.f32.mrb[34].mxu0 }
 0x3d3   : > { %1790 = vst.msk [vmem:[%s2938_s23 + $0x1c] sm:$0xf] %vm1782_vm12, %v2083_v44  ;;  %v1696_v53 = vadd.f32 %v1680_v5, %v1648_v45  ;;  %v1651_v54 = vadd.f32 %v2240_v51, %v3010_v55  ;;  %v1642_v56 = vpop.f32.mrb[35].mxu0 }
 0x3d4   : > { %1788 = vst.msk [vmem:[%s2938_s23 + $0x14] sm:$0xf] %vm1782_vm12, %v2081_v48  ;;  %v1694_v8 = vadd.f32 %v1678_v43, %v1640_v49  ;;  %v1643_v50 = vadd.f32 %v3010_v55, %v1642_v56 }
 0x3d5   : > { %v1712_v57 = vmax.f32 %v1696_v53, 0.0  ;;  %v1697_v58 = vadd.f32 %v1681_v47, %v1651_v54 }
 0x3d6   : > { %v1710_v59 = vmax.f32 %v1694_v8, 0.0  ;;  %v1695_v60 = vadd.f32 %v1679_v52, %v1643_v50 }
 0x3d7   : > { %v2086_v7 = vpack.c.bf16 %v1712_v57, %v1712_v57  ;;  %v1713_v61 = vmax.f32 %v1697_v58, 0.0 }
 0x3d8   : > { %v2084_v63 = vpack.c.bf16 %v1710_v59, %v1710_v59  ;;  %v1711_v0 = vmax.f32 %v1695_v60, 0.0  ;;  %v2243_v1 = vpop.f32.mrb[36].mxu0 }
 0x3d9   : > { %1793 = vst.msk [vmem:[%s2938_s23 + $0x28] sm:$0xf] %vm1782_vm12, %v2086_v7  ;;  %v2087_v11 = vpack.c.bf16 %v1713_v61, %v1713_v61  ;;  %v1664_v13 = vadd.f32 %v2243_v1, %v3010_v55  ;;  %v1655_v12 = vpop.f32.mrb[37].mxu0 }
 0x3da   : > { %1791 = vst.msk [vmem:[%s2938_s23 + $0x20] sm:$0xf] %vm1782_vm12, %v2084_v63  ;;  %v2085_v15 = vpack.c.bf16 %v1711_v0, %v1711_v0  ;;  %v1656_v16 = vadd.f32 %v3010_v55, %v1655_v12  ;;  %v2244_v3 = vpop.f32.mrb[38].mxu0 }
 0x3db   : > { %1794 = vst.msk [vmem:[%s2938_s23 + $0x2c] sm:$0xf] %vm1782_vm12, %v2087_v11  ;;  %v1700_v19 = vadd.f32 %v1684_v62, %v1664_v13  ;;  %v1667_v2 = vadd.f32 %v2244_v3, %v3010_v55  ;;  %v1658_v20 = vpop.f32.mrb[39].mxu0 }
 0x3dc   : > { %1792 = vst.msk [vmem:[%s2938_s23 + $0x24] sm:$0xf] %vm1782_vm12, %v2085_v15  ;;  %v1698_v10 = vadd.f32 %v1682_v4, %v1656_v16  ;;  %v1659_v23 = vadd.f32 %v3010_v55, %v1658_v20 }
 0x3dd   : > { %v1716_v24 = vmax.f32 %v1700_v19, 0.0  ;;  %v1701_v25 = vadd.f32 %v1685_v14, %v1667_v2 }
 0x3de   : > { %v1714_v26 = vmax.f32 %v1698_v10, 0.0  ;;  %v1699_v9 = vadd.f32 %v1683_v18, %v1659_v23 }
 0x3df   : > { %v2090_v27 = vpack.c.bf16 %v1716_v24, %v1716_v24  ;;  %v1717_v29 = vmax.f32 %v1701_v25, 0.0 }
 0x3e0   : > { %v2088_v17 = vpack.c.bf16 %v1714_v26, %v1714_v26  ;;  %v1715_v22 = vmax.f32 %v1699_v9, 0.0 }
 0x3e1   : > { %1797 = vst.msk [vmem:[%s2938_s23 + $0x38] sm:$0xf] %vm1782_vm12, %v2090_v27  ;;  %v2091_v21 = vpack.c.bf16 %v1717_v29, %v1717_v29 }
 0x3e2   : > { %1795 = vst.msk [vmem:[%s2938_s23 + $0x30] sm:$0xf] %vm1782_vm12, %v2088_v17  ;;  %v2089_v55 = vpack.c.bf16 %v1715_v22, %v1715_v22 }
 0x3e3   : > { %1798 = vst.msk [vmem:[%s2938_s23 + $0x3c] sm:$0xf] %vm1782_vm12, %v2091_v21 }
 0x3e4   : > { %1796 = vst.msk [vmem:[%s2938_s23 + $0x34] sm:$0xf] %vm1782_vm12, %v2089_v55 }
 0x3e5   : > { %2403 = shalt.err (!%p2400_p13)
}
 0x3e6   : > { %s2404_s23 = scalar_lea.hbm %s3076_s17, 1024  ;;  %s2408_s27 = scalar_lea.hbm %s3149_s9, 4096 }
 0x3e7   : > { %p2405_p0 = scmp.ne.s32.totalorder %s3076_s17, %s2404_s23  ;;  %p2409_p4 = scmp.lt.u32.totalorder %s3076_s17, %s3149_s9 }
 0x3e8   : > { %p2410_p5 = scmp.lt.u32.totalorder %s2408_s27, %s2404_s23  ;;  %p2412_p7 = scmp.lt.u32.totalorder %s2404_s23, %s3076_s17 }
 0x3e9   : > { %p2406_p1 = pnand %p2405_p0, %p2595_p3 }
 0x3ea   : > { %p2411_p6 = por %p2410_p5, %p2409_p4 }
 0x3eb   : > { %p2407_p2 = pneg %p2406_p1 }
 0x3ec   : > { %p2413_p9 = por %p2412_p7, %p2411_p6 }
 0x3ee   : > { %p2414_p10 = pnand %p2413_p9, %p2407_p2 }
 0x3f0   : > { %2417 = shalt.err (!%p2414_p10)
}
 0x3f1   : > { %s2492_s26 = smov 64   ;;  %s2493_s12 = smov 4  }
 0x3f2   : > { %2286 = dma.vmem_to_hbm [thread:$0]  (%p2595_p3), %s3078_s29, 1024, %s3076_s17, %s3088_s15, %s2492_s26, %s2492_s26, %s2493_s12  }
 0x3f3 PF: > { %s3171_s13 = sld [smem:[#allocation6_spill]]  ;;  %p2292_p11 = scmp.ge.s32.totalorder %s2484_s16, 2 }
 0x3f5   : > { %p2289_p12 = pnand %p2292_p11, %p2604_p8 }
 0x3f9   : > { %s1830_s24 = sand.u32 1, %s3171_s13  }
 0x3fa   : > { %s1831_s28 = scalar_lea.sflag [#allocation4], %s1830_s24 }
 0x3fb   : > { %2451 = dma.done.wait (!%p2289_p12), %s1831_s28, 1024  }
 0x3fc   : > { %2453 = vsyncadd (!%p2289_p12), %s1831_s28, 4294966272  ;;  %s22_s16 = sadd.s32 1, %s2484_s16   ;;  %s3173_s20 = sld [smem:[#allocation7_spill]] }
 0x3fd   : > { %p19_p13 = scmp.ge.s32.totalorder %s22_s16, 6   ;;  %s3174_s11 = sld [smem:[#allocation13_spill]] }
 0x3fe   : > { %s3175_s12 = sld [smem:[#allocation8_spill]]  ;;  %s3176_s13 = sld [smem:[#allocation9_spill]] }
 0x3ff   : > { %s3177_s14 = sld [smem:[#allocation10_spill]]  ;;  %s3178_s15 = sld [smem:[#allocation11_spill]] }
 0x400   : > { %s3179_s30 = smov %s2460_s10  ;;  %21 = sbr.rel (!%p19_p13) target bundleno = 7 (0x7), region = 110 }
 0x402   : > { %s3180_s10 = smov %s3173_s20 }
 0x407   :  { %1836 = vsyncpa [#allocation4], 1 }
 0x408   :  { %1838 = vsyncpa [#allocation4 + $0x1], 1 }

</bundles_post_ra>
